<compile_context>
chip_gen: v7x
topology: tpu7x:2x2x1
jax: 0.10.0
libtpu: 0.0.40
codegen_flags: <defaults>
</compile_context>

<pallas_src>
import jax
import jax.numpy as jnp
from jax.experimental import pallas as pl
from jax.experimental.pallas import tpu as pltpu  # noqa: F401  (TPU backend)

# ---- synthetic config (cf.*) -------------------------------------------------
NZ = 16           # cf.nz
NGF = 32          # cf.ngf
IMAGE_SIZE = 64   # cf.image_size
BATCH = 256       # many rows per call to amortize fixed per-call overhead
EPS = 1e-5
LANE = 128        # TPU lane width; all layer outputs run padded to this

DIMS = [(NZ, NGF), (NGF, NGF), (NGF, NGF), (NGF, IMAGE_SIZE)]


def generator_kernel(x_ref, w0_ref, w_ref, gb_ref, o_ref):
    """4x fused [Linear -> BatchNorm1d(training stats) -> ReLU], lane width 128.

    bf16 MXU operands, f32 accumulation and f32 BN/elementwise math.
    """
    inv_b = 1.0 / x_ref.shape[0]   # exact for power-of-two batches

    def bn_relu(y, i):
        # y: (B, 128) f32 pre-activation of layer i (bias already folded away).
        mean = jnp.sum(y, axis=0, keepdims=True) * inv_b                 # (1, 128)
        centered = y - mean
        var = jnp.sum(centered * centered, axis=0, keepdims=True) * inv_b
        scale = gb_ref[i:i + 1, :] * jax.lax.rsqrt(var + EPS)            # gamma row
        shift = gb_ref[4 + i:5 + i, :] - mean * scale                    # beta row
        return jnp.maximum(y * scale + shift, 0.0)                       # ReLU

    # Layer 0: true K = NZ = 16 contraction against the (16, 128) padded weight.
    y = jnp.dot(x_ref[...].astype(jnp.bfloat16), w0_ref[...],
                preferred_element_type=jnp.float32)                      # (B, 128)
    h = bn_relu(y, 0)

    # Layers 1..3: lane-dense K = 128 contractions (static unroll).
    for i in range(1, 4):
        y = jnp.dot(h.astype(jnp.bfloat16), w_ref[i - 1],
                    preferred_element_type=jnp.float32)
        h = bn_relu(y, i)

    o_ref[...] = h   # (B, 128) unmasked lane-dense store; padded cols are exactly 0


def pack_params(params):
    """Pack per-layer (W, b, gamma, beta) into lane-dense slabs.

    * Layer-0 weight kept separate as (NZ, 128) so x needs no padding and the
      first matmul contracts only K=16.
    * Layers 1-3 weights packed into a (3, 128, 128) slab.
    * gamma/beta packed into an (8, 128) slab: rows 0..3 gamma, rows 4..7 beta.
    * Linear biases intentionally dropped (removed exactly by BN mean
      subtraction in training mode).
    * Padded columns get weight = gamma = beta = 0 so they stay exactly zero.
    * Weight slabs stored in bf16 (MXU operands); gamma/beta stay f32.
    """
    w0 = jnp.zeros((NZ, LANE), jnp.float32)
    w_slab = jnp.zeros((3, LANE, LANE), jnp.float32)
    gb_slab = jnp.zeros((8, LANE), jnp.float32)
    for i, ((fan_in, fan_out), (w, _b, gamma, beta)) in enumerate(zip(DIMS, params)):
        if i == 0:
            w0 = w0.at[:fan_in, :fan_out].set(w)
        else:
            w_slab = w_slab.at[i - 1, :fan_in, :fan_out].set(w)
        gb_slab = gb_slab.at[i, :fan_out].set(gamma.reshape(-1))
        gb_slab = gb_slab.at[4 + i, :fan_out].set(beta.reshape(-1))
    return w0.astype(jnp.bfloat16), w_slab.astype(jnp.bfloat16), gb_slab


def generator_forward(x, w0, w_slab, gb_slab):
    """x: (B, NZ) f32.  Returns the padded (B, 128) slab (columns >= IMAGE_SIZE
    are exactly zero).  Consumers should slice [:, :IMAGE_SIZE] lazily where the
    result is next used to avoid an extra full-batch HBM round trip here."""
    b = x.shape[0]
    # TODO(synk): for batches too large for VMEM (first on v7x's 64 MiB), switch
    # to a grid-tiled two-phase BN (accumulate per-feature sum / sum-of-squares,
    # then normalize) with dimension_semantics=("parallel", ...).
    return pl.pallas_call(
        generator_kernel,
        out_shape=jax.ShapeDtypeStruct((b, LANE), jnp.float32),
        in_specs=[
            pl.BlockSpec((b, NZ), lambda: (0, 0)),             # x, unpadded (K=16)
            pl.BlockSpec((NZ, LANE), lambda: (0, 0)),          # layer-0 weight (bf16)
            pl.BlockSpec((3, LANE, LANE), lambda: (0, 0, 0)),  # layers 1-3 weights (bf16)
            pl.BlockSpec((8, LANE), lambda: (0, 0)),           # gamma/beta slab (f32)
        ],
        out_specs=pl.BlockSpec((b, LANE), lambda: (0, 0)),
    )(x, w0, w_slab, gb_slab)


def init_params(key):
    """PyTorch-default-style init: Linear U(-1/sqrt(fan_in), 1/sqrt(fan_in)),
    BatchNorm gamma=1, beta=0.  Bias kept here only for the reference check."""
    params = []
    for (fan_in, fan_out) in DIMS:
        key, kw, kb = jax.random.split(key, 3)
        bound = 1.0 / (fan_in ** 0.5)
        w = jax.random.uniform(kw, (fan_in, fan_out), jnp.float32, -bound, bound)
        b = jax.random.uniform(kb, (1, fan_out), jnp.float32, -bound, bound)
        gamma = jnp.ones((1, fan_out), jnp.float32)
        beta = jnp.zeros((1, fan_out), jnp.float32)
        params.append((w, b, gamma, beta))
    return params


def reference_forward(x, params, matmul_dtype=jnp.float32):
    """Pure-JAX reference matching the PyTorch module (bias included,
    training-mode BatchNorm with biased variance).  `matmul_dtype=jnp.bfloat16`
    mimics the kernel's bf16 MXU operands for a tight numerical comparison."""
    h = x
    for (w, b, g, be) in params:
        y = jnp.dot(h.astype(matmul_dtype), w.astype(matmul_dtype),
                    preferred_element_type=jnp.float32) + b
        mean = jnp.mean(y, axis=0, keepdims=True)
        var = jnp.mean((y - mean) ** 2, axis=0, keepdims=True)
        h = jnp.maximum((y - mean) / jnp.sqrt(var + EPS) * g + be, 0.0)
    return h


if __name__ == "__main__":
    key = jax.random.PRNGKey(0)
    key, kx = jax.random.split(key)
    x = jax.random.normal(kx, (BATCH, NZ), jnp.float32)
    params = init_params(key)

    w0, w_slab, gb_slab = pack_params(params)
    out_padded = generator_forward(x, w0, w_slab, gb_slab)
    out_padded = jax.block_until_ready(out_padded)
    assert out_padded.shape == (BATCH, LANE)

    # Lazy slice at the point of use (only needed for the reference check).
    out = out_padded[:, :IMAGE_SIZE]
    assert out.shape == (BATCH, IMAGE_SIZE)

    # Tight check vs a reference using the same bf16 matmul operands.
    ref_bf16 = reference_forward(x, params, matmul_dtype=jnp.bfloat16)
    assert jnp.allclose(out, ref_bf16, atol=2e-3, rtol=2e-3), \
        "mismatch vs bf16-matmul JAX reference"

    # Looser sanity check vs the exact f32 PyTorch-semantics reference
    # (bf16 MXU operands introduce ~1e-2-scale deviations after 4 BN layers).
    ref_f32 = reference_forward(x, params)
    assert jnp.allclose(out, ref_f32, atol=1.5e-1, rtol=1.5e-1), \
        "mismatch vs f32 JAX reference"

    # Padded feature columns must stay exactly zero.
    assert bool(jnp.all(out_padded[:, IMAGE_SIZE:] == 0.0))

    print("KERNEL_OK")
</pallas_src>

<mosaic_0001>
module attributes {stable_mosaic.version = 11 : i64} {
  func.func @generator_kernel(%arg0: memref<256x16xf32, #tpu.memory_space<vmem>>, %arg1: memref<16x128xbf16, #tpu.memory_space<vmem>>, %arg2: memref<3x128x128xbf16, #tpu.memory_space<vmem>>, %arg3: memref<8x128xf32, #tpu.memory_space<vmem>>, %arg4: memref<256x128xf32, #tpu.memory_space<vmem>>) attributes {dimension_semantics = [], scalar_prefetch = 0 : i64, scratch_operands = 0 : i64, tpu.core_type = #tpu.core_type<tc>} {
    %c0 = arith.constant 0 : index
    %c0_0 = arith.constant 0 : index
    %0 = vector.load %arg0[%c0, %c0_0] : memref<256x16xf32, #tpu.memory_space<vmem>>, vector<256x16xf32>
    %1 = arith.truncf %0 : vector<256x16xf32> to vector<256x16xbf16>
    %c0_1 = arith.constant 0 : index
    %c0_2 = arith.constant 0 : index
    %2 = vector.load %arg1[%c0_1, %c0_2] : memref<16x128xbf16, #tpu.memory_space<vmem>>, vector<16x128xbf16>
    %cst = arith.constant dense<0.000000e+00> : vector<256x128xf32>
    %3 = tpu.matmul %1, %2, %cst {dimension_numbers = #tpu.dot_dimension_numbers<[1], [0], [0], [1], [0, 0, 1, 1], [], []>} : vector<256x16xbf16>, vector<16x128xbf16>, vector<256x128xf32> -> vector<256x128xf32>
    %cst_3 = arith.constant dense<0.000000e+00> : vector<128xf32>
    %4 = vector.multi_reduction <add>, %3, %cst_3 [0] : vector<256x128xf32> to vector<128xf32>
    %5 = vector.shape_cast %4 : vector<128xf32> to vector<1x128xf32>
    %cst_4 = arith.constant 3.906250e-03 : f32
    %6 = vector.broadcast %cst_4 : f32 to vector<1x128xf32>
    %7 = arith.mulf %5, %6 : vector<1x128xf32>
    %8 = vector.broadcast %7 : vector<1x128xf32> to vector<256x128xf32>
    %9 = arith.subf %3, %8 : vector<256x128xf32>
    %10 = arith.mulf %9, %9 : vector<256x128xf32>
    %cst_5 = arith.constant dense<0.000000e+00> : vector<128xf32>
    %11 = vector.multi_reduction <add>, %10, %cst_5 [0] : vector<256x128xf32> to vector<128xf32>
    %12 = vector.shape_cast %11 : vector<128xf32> to vector<1x128xf32>
    %cst_6 = arith.constant 3.906250e-03 : f32
    %13 = vector.broadcast %cst_6 : f32 to vector<1x128xf32>
    %14 = arith.mulf %12, %13 : vector<1x128xf32>
    %c0_7 = arith.constant 0 : index
    %c0_8 = arith.constant 0 : index
    %15 = vector.load %arg3[%c0_7, %c0_8] : memref<8x128xf32, #tpu.memory_space<vmem>>, vector<1x128xf32>
    %cst_9 = arith.constant 9.99999974E-6 : f32
    %16 = vector.broadcast %cst_9 : f32 to vector<1x128xf32>
    %17 = arith.addf %14, %16 : vector<1x128xf32>
    %18 = math.rsqrt %17 : vector<1x128xf32>
    %19 = arith.mulf %15, %18 : vector<1x128xf32>
    %c4 = arith.constant 4 : index
    %c0_10 = arith.constant 0 : index
    %20 = vector.load %arg3[%c4, %c0_10] : memref<8x128xf32, #tpu.memory_space<vmem>>, vector<1x128xf32>
    %21 = arith.mulf %7, %19 : vector<1x128xf32>
    %22 = arith.subf %20, %21 : vector<1x128xf32>
    %23 = vector.broadcast %19 : vector<1x128xf32> to vector<256x128xf32>
    %24 = arith.mulf %3, %23 : vector<256x128xf32>
    %25 = vector.broadcast %22 : vector<1x128xf32> to vector<256x128xf32>
    %26 = arith.addf %24, %25 : vector<256x128xf32>
    %cst_11 = arith.constant 0.000000e+00 : f32
    %27 = vector.broadcast %cst_11 : f32 to vector<256x128xf32>
    %28 = arith.maximumf %26, %27 : vector<256x128xf32>
    %29 = arith.truncf %28 : vector<256x128xf32> to vector<256x128xbf16>
    %c0_12 = arith.constant 0 : index
    %c0_13 = arith.constant 0 : index
    %c0_14 = arith.constant 0 : index
    %30 = vector.load %arg2[%c0_12, %c0_13, %c0_14] : memref<3x128x128xbf16, #tpu.memory_space<vmem>>, vector<1x128x128xbf16>
    %31 = vector.shape_cast %30 : vector<1x128x128xbf16> to vector<128x128xbf16>
    %cst_15 = arith.constant dense<0.000000e+00> : vector<256x128xf32>
    %32 = tpu.matmul %29, %31, %cst_15 {dimension_numbers = #tpu.dot_dimension_numbers<[1], [0], [0], [1], [0, 0, 1, 1], [], []>} : vector<256x128xbf16>, vector<128x128xbf16>, vector<256x128xf32> -> vector<256x128xf32>
    %cst_16 = arith.constant dense<0.000000e+00> : vector<128xf32>
    %33 = vector.multi_reduction <add>, %32, %cst_16 [0] : vector<256x128xf32> to vector<128xf32>
    %34 = vector.shape_cast %33 : vector<128xf32> to vector<1x128xf32>
    %cst_17 = arith.constant 3.906250e-03 : f32
    %35 = vector.broadcast %cst_17 : f32 to vector<1x128xf32>
    %36 = arith.mulf %34, %35 : vector<1x128xf32>
    %37 = vector.broadcast %36 : vector<1x128xf32> to vector<256x128xf32>
    %38 = arith.subf %32, %37 : vector<256x128xf32>
    %39 = arith.mulf %38, %38 : vector<256x128xf32>
    %cst_18 = arith.constant dense<0.000000e+00> : vector<128xf32>
    %40 = vector.multi_reduction <add>, %39, %cst_18 [0] : vector<256x128xf32> to vector<128xf32>
    %41 = vector.shape_cast %40 : vector<128xf32> to vector<1x128xf32>
    %cst_19 = arith.constant 3.906250e-03 : f32
    %42 = vector.broadcast %cst_19 : f32 to vector<1x128xf32>
    %43 = arith.mulf %41, %42 : vector<1x128xf32>
    %c1 = arith.constant 1 : index
    %c0_20 = arith.constant 0 : index
    %44 = vector.load %arg3[%c1, %c0_20] : memref<8x128xf32, #tpu.memory_space<vmem>>, vector<1x128xf32>
    %cst_21 = arith.constant 9.99999974E-6 : f32
    %45 = vector.broadcast %cst_21 : f32 to vector<1x128xf32>
    %46 = arith.addf %43, %45 : vector<1x128xf32>
    %47 = math.rsqrt %46 : vector<1x128xf32>
    %48 = arith.mulf %44, %47 : vector<1x128xf32>
    %c5 = arith.constant 5 : index
    %c0_22 = arith.constant 0 : index
    %49 = vector.load %arg3[%c5, %c0_22] : memref<8x128xf32, #tpu.memory_space<vmem>>, vector<1x128xf32>
    %50 = arith.mulf %36, %48 : vector<1x128xf32>
    %51 = arith.subf %49, %50 : vector<1x128xf32>
    %52 = vector.broadcast %48 : vector<1x128xf32> to vector<256x128xf32>
    %53 = arith.mulf %32, %52 : vector<256x128xf32>
    %54 = vector.broadcast %51 : vector<1x128xf32> to vector<256x128xf32>
    %55 = arith.addf %53, %54 : vector<256x128xf32>
    %cst_23 = arith.constant 0.000000e+00 : f32
    %56 = vector.broadcast %cst_23 : f32 to vector<256x128xf32>
    %57 = arith.maximumf %55, %56 : vector<256x128xf32>
    %58 = arith.truncf %57 : vector<256x128xf32> to vector<256x128xbf16>
    %c1_24 = arith.constant 1 : index
    %c0_25 = arith.constant 0 : index
    %c0_26 = arith.constant 0 : index
    %59 = vector.load %arg2[%c1_24, %c0_25, %c0_26] : memref<3x128x128xbf16, #tpu.memory_space<vmem>>, vector<1x128x128xbf16>
    %60 = vector.shape_cast %59 : vector<1x128x128xbf16> to vector<128x128xbf16>
    %cst_27 = arith.constant dense<0.000000e+00> : vector<256x128xf32>
    %61 = tpu.matmul %58, %60, %cst_27 {dimension_numbers = #tpu.dot_dimension_numbers<[1], [0], [0], [1], [0, 0, 1, 1], [], []>} : vector<256x128xbf16>, vector<128x128xbf16>, vector<256x128xf32> -> vector<256x128xf32>
    %cst_28 = arith.constant dense<0.000000e+00> : vector<128xf32>
    %62 = vector.multi_reduction <add>, %61, %cst_28 [0] : vector<256x128xf32> to vector<128xf32>
    %63 = vector.shape_cast %62 : vector<128xf32> to vector<1x128xf32>
    %cst_29 = arith.constant 3.906250e-03 : f32
    %64 = vector.broadcast %cst_29 : f32 to vector<1x128xf32>
    %65 = arith.mulf %63, %64 : vector<1x128xf32>
    %66 = vector.broadcast %65 : vector<1x128xf32> to vector<256x128xf32>
    %67 = arith.subf %61, %66 : vector<256x128xf32>
    %68 = arith.mulf %67, %67 : vector<256x128xf32>
    %cst_30 = arith.constant dense<0.000000e+00> : vector<128xf32>
    %69 = vector.multi_reduction <add>, %68, %cst_30 [0] : vector<256x128xf32> to vector<128xf32>
    %70 = vector.shape_cast %69 : vector<128xf32> to vector<1x128xf32>
    %cst_31 = arith.constant 3.906250e-03 : f32
    %71 = vector.broadcast %cst_31 : f32 to vector<1x128xf32>
    %72 = arith.mulf %70, %71 : vector<1x128xf32>
    %c2 = arith.constant 2 : index
    %c0_32 = arith.constant 0 : index
    %73 = vector.load %arg3[%c2, %c0_32] : memref<8x128xf32, #tpu.memory_space<vmem>>, vector<1x128xf32>
    %cst_33 = arith.constant 9.99999974E-6 : f32
    %74 = vector.broadcast %cst_33 : f32 to vector<1x128xf32>
    %75 = arith.addf %72, %74 : vector<1x128xf32>
    %76 = math.rsqrt %75 : vector<1x128xf32>
    %77 = arith.mulf %73, %76 : vector<1x128xf32>
    %c6 = arith.constant 6 : index
    %c0_34 = arith.constant 0 : index
    %78 = vector.load %arg3[%c6, %c0_34] : memref<8x128xf32, #tpu.memory_space<vmem>>, vector<1x128xf32>
    %79 = arith.mulf %65, %77 : vector<1x128xf32>
    %80 = arith.subf %78, %79 : vector<1x128xf32>
    %81 = vector.broadcast %77 : vector<1x128xf32> to vector<256x128xf32>
    %82 = arith.mulf %61, %81 : vector<256x128xf32>
    %83 = vector.broadcast %80 : vector<1x128xf32> to vector<256x128xf32>
    %84 = arith.addf %82, %83 : vector<256x128xf32>
    %cst_35 = arith.constant 0.000000e+00 : f32
    %85 = vector.broadcast %cst_35 : f32 to vector<256x128xf32>
    %86 = arith.maximumf %84, %85 : vector<256x128xf32>
    %87 = arith.truncf %86 : vector<256x128xf32> to vector<256x128xbf16>
    %c2_36 = arith.constant 2 : index
    %c0_37 = arith.constant 0 : index
    %c0_38 = arith.constant 0 : index
    %88 = vector.load %arg2[%c2_36, %c0_37, %c0_38] : memref<3x128x128xbf16, #tpu.memory_space<vmem>>, vector<1x128x128xbf16>
    %89 = vector.shape_cast %88 : vector<1x128x128xbf16> to vector<128x128xbf16>
    %cst_39 = arith.constant dense<0.000000e+00> : vector<256x128xf32>
    %90 = tpu.matmul %87, %89, %cst_39 {dimension_numbers = #tpu.dot_dimension_numbers<[1], [0], [0], [1], [0, 0, 1, 1], [], []>} : vector<256x128xbf16>, vector<128x128xbf16>, vector<256x128xf32> -> vector<256x128xf32>
    %cst_40 = arith.constant dense<0.000000e+00> : vector<128xf32>
    %91 = vector.multi_reduction <add>, %90, %cst_40 [0] : vector<256x128xf32> to vector<128xf32>
    %92 = vector.shape_cast %91 : vector<128xf32> to vector<1x128xf32>
    %cst_41 = arith.constant 3.906250e-03 : f32
    %93 = vector.broadcast %cst_41 : f32 to vector<1x128xf32>
    %94 = arith.mulf %92, %93 : vector<1x128xf32>
    %95 = vector.broadcast %94 : vector<1x128xf32> to vector<256x128xf32>
    %96 = arith.subf %90, %95 : vector<256x128xf32>
    %97 = arith.mulf %96, %96 : vector<256x128xf32>
    %cst_42 = arith.constant dense<0.000000e+00> : vector<128xf32>
    %98 = vector.multi_reduction <add>, %97, %cst_42 [0] : vector<256x128xf32> to vector<128xf32>
    %99 = vector.shape_cast %98 : vector<128xf32> to vector<1x128xf32>
    %cst_43 = arith.constant 3.906250e-03 : f32
    %100 = vector.broadcast %cst_43 : f32 to vector<1x128xf32>
    %101 = arith.mulf %99, %100 : vector<1x128xf32>
    %c3 = arith.constant 3 : index
    %c0_44 = arith.constant 0 : index
    %102 = vector.load %arg3[%c3, %c0_44] : memref<8x128xf32, #tpu.memory_space<vmem>>, vector<1x128xf32>
    %cst_45 = arith.constant 9.99999974E-6 : f32
    %103 = vector.broadcast %cst_45 : f32 to vector<1x128xf32>
    %104 = arith.addf %101, %103 : vector<1x128xf32>
    %105 = math.rsqrt %104 : vector<1x128xf32>
    %106 = arith.mulf %102, %105 : vector<1x128xf32>
    %c7 = arith.constant 7 : index
    %c0_46 = arith.constant 0 : index
    %107 = vector.load %arg3[%c7, %c0_46] : memref<8x128xf32, #tpu.memory_space<vmem>>, vector<1x128xf32>
    %108 = arith.mulf %94, %106 : vector<1x128xf32>
    %109 = arith.subf %107, %108 : vector<1x128xf32>
    %110 = vector.broadcast %106 : vector<1x128xf32> to vector<256x128xf32>
    %111 = arith.mulf %90, %110 : vector<256x128xf32>
    %112 = vector.broadcast %109 : vector<1x128xf32> to vector<256x128xf32>
    %113 = arith.addf %111, %112 : vector<256x128xf32>
    %cst_47 = arith.constant 0.000000e+00 : f32
    %114 = vector.broadcast %cst_47 : f32 to vector<256x128xf32>
    %115 = arith.maximumf %113, %114 : vector<256x128xf32>
    %c0_48 = arith.constant 0 : index
    %c0_49 = arith.constant 0 : index
    %116 = vector.load %arg4[%c0_48, %c0_49] : memref<256x128xf32, #tpu.memory_space<vmem>>, vector<256x128xf32>
    tpu.vector_store %arg4[%c0_48, %c0_49], %115 {strides = array<i32>} : memref<256x128xf32, #tpu.memory_space<vmem>>, vector<256x128xf32>,
    return
  }
}

</mosaic_0001>

<bundles_post_ra>
// kernel: tpu_custom_call.1
= control target key start
LH: loop header
LB: loop body
LE: loop exit
PB: predicated region body
PF: predicated region fallthrough
CT: control target
= control target key end

     0   :  { %vm75_vm0 = vcmask 130048   ;;  %s3565_s0 = inlined_call_operand.vmem [shape: f32[256,16], index: 0, kind: input, shape index: {}]   ;;  %s3566_s1 = inlined_call_operand.vmem [shape: bf16[16,128], index: 1, kind: input, shape index: {}]   ;;  %s3567_s2 = inlined_call_operand.vmem [shape: bf16[3,128,128], index: 2, kind: input, shape index: {}]   ;;  %s3568_s3 = inlined_call_operand.vmem [shape: f32[8,128], index: 3, kind: input, shape index: {}]   ;;  %s3569_s4 = inlined_call_operand.hbm [shape: f32[256,128], index: 4, kind: output, shape index: {}]  }
   0x1   :  { %v2421_v0 = vld [vmem:[%s3566_s1] sm:$0xff]   ;;  %v20_v2 = vld [vmem:[%s3565_s0 + $0x8] sm:$0xff]  ;;  %v21_v3 = vld [vmem:[%s3565_s0 + $0x10] sm:$0xff] }
   0x2   :  { %v19_v1 = vld [vmem:[%s3565_s0] sm:$0xff]  ;;  %2224 = vmatprep.subr.bf16.mxu0 %v2421_v0  ;;  %v22_v5 = vld [vmem:[%s3565_s0 + $0x18] sm:$0xff]  ;;  %v24_v7 = vld [vmem:[%s3565_s0 + $0x28] sm:$0xff] }
   0x3   :  { %v51_v4 = vpack.c.bf16 %v20_v2, %v19_v1  ;;  %v23_v6 = vld [vmem:[%s3565_s0 + $0x20] sm:$0xff]  ;;  %2225 = vmatpush3.bf16.msra.mxu0 %v2421_v0  ;;  %v52_v8 = vpack.c.bf16 %v22_v5, %v21_v3  ;;  %v25_v10 = vld [vmem:[%s3565_s0 + $0x30] sm:$0xff]  ;;  %v26_v11 = vld [vmem:[%s3565_s0 + $0x38] sm:$0xff] }
   0x4   :  { %v53_v9 = vpack.c.bf16 %v24_v7, %v23_v6  ;;  %v27_v12 = vld [vmem:[%s3565_s0 + $0x40] sm:$0xff]  ;;  %v28_v13 = vld [vmem:[%s3565_s0 + $0x48] sm:$0xff]  ;;  %v54_v14 = vpack.c.bf16 %v26_v11, %v25_v10  ;;  %v29_v16 = vld [vmem:[%s3565_s0 + $0x50] sm:$0xff] }
   0x5   :  { %2226 = vmatprep.mubr.msk.bf16.mxu0 %vm75_vm0, %v51_v4  ;;  %v55_v15 = vpack.c.bf16 %v28_v13, %v27_v12  ;;  %v30_v17 = vld [vmem:[%s3565_s0 + $0x58] sm:$0xff]  ;;  %v31_v18 = vld [vmem:[%s3565_s0 + $0x60] sm:$0xff]  ;;  %v32_v19 = vld [vmem:[%s3565_s0 + $0x68] sm:$0xff] }
   0x6   :  { %2227 = vmatmul.mubr.msk.bf16.vlgmr.msra.gmra.mrb[0].mxu0 %vm75_vm0, %v52_v8  ;;  %v56_v20 = vpack.c.bf16 %v30_v17, %v29_v16  ;;  %v57_v21 = vpack.c.bf16 %v32_v19, %v31_v18  ;;  %v33_v22 = vld [vmem:[%s3565_s0 + $0x70] sm:$0xff]  ;;  %v34_v23 = vld [vmem:[%s3565_s0 + $0x78] sm:$0xff]  ;;  %v35_v24 = vld [vmem:[%s3565_s0 + $0x80] sm:$0xff] }
   0x7   :  { %2230 = vmatprep.mubr.msk.bf16.mxu0 %vm75_vm0, %v53_v9  ;;  %v36_v25 = vld [vmem:[%s3565_s0 + $0x88] sm:$0xff]  ;;  %v58_v26 = vpack.c.bf16 %v34_v23, %v33_v22 }
   0x8   :  { %v59_v27 = vpack.c.bf16 %v36_v25, %v35_v24 }
   0xe   :  { %2231 = vmatmul.mubr.msk.bf16.gmra.mrb[4].mxu0 %vm75_vm0, %v54_v14 }
   0xf   :  { %2234 = vmatprep.mubr.msk.bf16.mxu0 %vm75_vm0, %v55_v15 }
  0x16   :  { %2235 = vmatmul.mubr.msk.bf16.gmra.mrb[8].mxu0 %vm75_vm0, %v56_v20 }
  0x17   :  { %2238 = vmatprep.mubr.msk.bf16.mxu0 %vm75_vm0, %v57_v21 }
  0x18   :  { %9 = vsyncpa [#allocation3], 0  ;;  %v37_v28 = vld [vmem:[%s3565_s0 + $0x90] sm:$0xff]  ;;  %v38_v29 = vld [vmem:[%s3565_s0 + $0x98] sm:$0xff] }
  0x19   :  { %v39_v30 = vld [vmem:[%s3565_s0 + $0xa0] sm:$0xff]  ;;  %v40_v31 = vld [vmem:[%s3565_s0 + $0xa8] sm:$0xff]  ;;  %v60_v32 = vpack.c.bf16 %v38_v29, %v37_v28  ;;  %v41_v34 = vld [vmem:[%s3565_s0 + $0xb0] sm:$0xff] }
  0x1a   :  { %v61_v33 = vpack.c.bf16 %v40_v31, %v39_v30  ;;  %v42_v35 = vld [vmem:[%s3565_s0 + $0xb8] sm:$0xff]  ;;  %v43_v36 = vld [vmem:[%s3565_s0 + $0xc0] sm:$0xff]  ;;  %v44_v37 = vld [vmem:[%s3565_s0 + $0xc8] sm:$0xff] }
  0x1b   :  { %v62_v38 = vpack.c.bf16 %v42_v35, %v41_v34  ;;  %v63_v39 = vpack.c.bf16 %v44_v37, %v43_v36  ;;  %v45_v40 = vld [vmem:[%s3565_s0 + $0xd0] sm:$0xff]  ;;  %v46_v41 = vld [vmem:[%s3565_s0 + $0xd8] sm:$0xff]  ;;  %v47_v42 = vld [vmem:[%s3565_s0 + $0xe0] sm:$0xff] }
  0x1c   :  { %v48_v43 = vld [vmem:[%s3565_s0 + $0xe8] sm:$0xff]  ;;  %v64_v44 = vpack.c.bf16 %v46_v41, %v45_v40  ;;  %v49_v46 = vld [vmem:[%s3565_s0 + $0xf0] sm:$0xff]  ;;  %v50_v47 = vld [vmem:[%s3565_s0 + $0xf8] sm:$0xff] }
  0x1d   :  { %v65_v45 = vpack.c.bf16 %v48_v43, %v47_v42  ;;  %v66_v48 = vpack.c.bf16 %v50_v47, %v49_v46  ;;  %v2422_v34 = vld [vmem:[%s3567_s2] sm:$0xff]  }
  0x1e   :  { %2239 = vmatmul.mubr.msk.bf16.gmra.mrb[12].mxu0 %vm75_vm0, %v58_v26  ;;  %2258 = vmatprep.subr.bf16.mxu1 %v2422_v34 }
  0x1f   :  { %2242 = vmatprep.mubr.msk.bf16.mxu0 %vm75_vm0, %v59_v27  ;;  %2259 = vmatpush3.bf16.msra.mxu1 %v2422_v34 }
  0x26   :  { %2243 = vmatmul.mubr.msk.bf16.gmra.mrb[16].mxu0 %vm75_vm0, %v60_v32 }
  0x27   :  { %2246 = vmatprep.mubr.msk.bf16.mxu0 %vm75_vm0, %v61_v33 }
  0x2e   :  { %2247 = vmatmul.mubr.msk.bf16.gmra.mrb[20].mxu0 %vm75_vm0, %v62_v38 }
  0x2f   :  { %2250 = vmatprep.mubr.msk.bf16.mxu0 %vm75_vm0, %v63_v39  ;;  %v2423_v39 = vld [vmem:[%s3567_s2 + $0x8] sm:$0xff]  }
  0x30   :  { %2260 = vmatprep.subr.bf16.mxu1 %v2423_v39 }
  0x31   :  { %2261 = vmatpush3.bf16.msra.mxu1 %v2423_v39 }
  0x36   :  { %2251 = vmatmul.mubr.msk.bf16.gmra.mrb[24].mxu0 %vm75_vm0, %v64_v44  ;;  %v2424_v44 = vld [vmem:[%s3567_s2 + $0x10] sm:$0xff]  }
  0x37   :  { %2254 = vmatprep.mubr.msk.bf16.mxu0 %vm75_vm0, %v65_v45  ;;  %2262 = vmatprep.subr.bf16.mxu1 %v2424_v44 }
  0x38   :  { %2263 = vmatpush3.bf16.msra.mxu1 %v2424_v44 }
  0x3e   :  { %2255 = vmatmul.mubr.msk.bf16.gmra.mrb[28].mxu0 %vm75_vm0, %v66_v48 }
  0xd9   :  { %v2621_v49 = vpop.f32.mrb[0].mxu0 }
  0xda   :  { %v2623_v50 = vpop.f32.mrb[1].mxu0 }
  0xdb   :  { %v2625_v51 = vpop.f32.mrb[2].mxu0 }
  0xdc   :  { %v2627_v52 = vpop.f32.mrb[3].mxu0 }
  0xdd   :  { %v285_v53 = vadd.f32 %v2627_v52, %v2623_v50 }
  0xdf   :  { %v286_v54 = vadd.f32 %v2621_v49, %v285_v53  ;;  %v2425_v53 = vld [vmem:[%s3567_s2 + $0x18] sm:$0xff]  }
  0xe0   :  { %2264 = vmatprep.subr.bf16.mxu1 %v2425_v53 }
  0xe1   :  { %v2632_v55 = vpop.f32.mrb[4].mxu0  ;;  %v287_v56 = vadd.f32 %v2625_v51, %v286_v54  ;;  %2265 = vmatpush3.bf16.msra.mxu1 %v2425_v53 }
  0xe2   :  { %v2635_v57 = vpop.f32.mrb[5].mxu0 }
  0xe3   :  { %v288_v58 = vadd.f32 %v287_v56, %v2635_v57  ;;  %v2638_v59 = vpop.f32.mrb[6].mxu0 }
  0xe4   :  { %v2640_v60 = vpop.f32.mrb[7].mxu0 }
  0xe5   :  { %v289_v61 = vadd.f32 %v288_v58, %v2640_v60  ;;  %v2426_v58 = vld [vmem:[%s3567_s2 + $0x20] sm:$0xff]  }
  0xe6   :  { %2266 = vmatprep.subr.bf16.mxu1 %v2426_v58 }
  0xe7   :  { %v290_v62 = vadd.f32 %v2632_v55, %v289_v61  ;;  %2267 = vmatpush3.bf16.msra.mxu1 %v2426_v58 }
  0xe9   :  { %v2644_v63 = vpop.f32.mrb[8].mxu0  ;;  %v291_v0 = vadd.f32 %v2638_v59, %v290_v62 }
  0xea   :  { %v2647_v1 = vpop.f32.mrb[9].mxu0 }
  0xeb   :  { %v292_v2 = vadd.f32 %v291_v0, %v2647_v1  ;;  %v2650_v3 = vpop.f32.mrb[10].mxu0  ;;  %v2427_v0 = vld [vmem:[%s3567_s2 + $0x28] sm:$0xff]  }
  0xec   :  { %v2652_v4 = vpop.f32.mrb[11].mxu0  ;;  %2268 = vmatprep.subr.bf16.mxu1 %v2427_v0 }
  0xed   :  { %v293_v5 = vadd.f32 %v292_v2, %v2652_v4  ;;  %2269 = vmatpush3.bf16.msra.mxu1 %v2427_v0 }
  0xef   :  { %v294_v6 = vadd.f32 %v2644_v63, %v293_v5 }
  0xf1   :  { %v2656_v7 = vpop.f32.mrb[12].mxu0  ;;  %v295_v8 = vadd.f32 %v2650_v3, %v294_v6  ;;  %v2428_v6 = vld [vmem:[%s3567_s2 + $0x30] sm:$0xff]  }
  0xf2   :  { %v2659_v9 = vpop.f32.mrb[13].mxu0  ;;  %2270 = vmatprep.subr.bf16.mxu1 %v2428_v6 }
  0xf3   :  { %v296_v10 = vadd.f32 %v295_v8, %v2659_v9  ;;  %v2662_v11 = vpop.f32.mrb[14].mxu0  ;;  %2271 = vmatpush3.bf16.msra.mxu1 %v2428_v6 }
  0xf4   :  { %v2664_v12 = vpop.f32.mrb[15].mxu0 }
  0xf5   :  { %v297_v13 = vadd.f32 %v296_v10, %v2664_v12  ;;  %v2429_v10 = vld [vmem:[%s3567_s2 + $0x38] sm:$0xff]  }
  0xf6   :  { %2272 = vmatprep.subr.bf16.mxu1 %v2429_v10 }
  0xf7   :  { %v298_v14 = vadd.f32 %v2656_v7, %v297_v13  ;;  %2273 = vmatpush3.bf16.msra.mxu1 %v2429_v10 }
  0xf9   :  { %v2668_v15 = vpop.f32.mrb[16].mxu0  ;;  %v299_v16 = vadd.f32 %v2662_v11, %v298_v14 }
  0xfa   :  { %v2671_v17 = vpop.f32.mrb[17].mxu0 }
  0xfb   :  { %v300_v18 = vadd.f32 %v299_v16, %v2671_v17  ;;  %v2674_v19 = vpop.f32.mrb[18].mxu0 }
  0xfc   :  { %v2676_v20 = vpop.f32.mrb[19].mxu0 }
  0xfd   :  { %v301_v21 = vadd.f32 %v300_v18, %v2676_v20 }
  0xff   :  { %v302_v22 = vadd.f32 %v2668_v15, %v301_v21 }
 0x101   :  { %v2680_v23 = vpop.f32.mrb[20].mxu0  ;;  %v303_v24 = vadd.f32 %v2674_v19, %v302_v22 }
 0x102   :  { %v2683_v25 = vpop.f32.mrb[21].mxu0 }
 0x103   :  { %v304_v26 = vadd.f32 %v303_v24, %v2683_v25  ;;  %v2686_v27 = vpop.f32.mrb[22].mxu0 }
 0x104   :  { %v2688_v28 = vpop.f32.mrb[23].mxu0 }
 0x105   :  { %v305_v29 = vadd.f32 %v304_v26, %v2688_v28 }
 0x107   :  { %v306_v30 = vadd.f32 %v2680_v23, %v305_v29 }
 0x109   :  { %v2692_v31 = vpop.f32.mrb[24].mxu0  ;;  %v307_v32 = vadd.f32 %v2686_v27, %v306_v30 }
 0x10a   :  { %v2695_v33 = vpop.f32.mrb[25].mxu0 }
 0x10b   :  { %v308_v35 = vadd.f32 %v307_v32, %v2695_v33  ;;  %v2701_v36 = vpop.f32.mrb[26].mxu0 }
 0x10c   :  { %v2703_v37 = vpop.f32.mrb[27].mxu0 }
 0x10d   :  { %v309_v38 = vadd.f32 %v308_v35, %v2703_v37 }
 0x10f   :  { %v310_v40 = vadd.f32 %v2692_v31, %v309_v38 }
 0x111   :  { %v2710_v41 = vpop.f32.mrb[28].mxu0  ;;  %v311_v42 = vadd.f32 %v2701_v36, %v310_v40 }
 0x112   :  { %v2713_v43 = vpop.f32.mrb[29].mxu0 }
 0x113   :  { %v312_v45 = vadd.f32 %v311_v42, %v2713_v43  ;;  %v2719_v46 = vpop.f32.mrb[30].mxu0 }
 0x114   :  { %v2721_v47 = vpop.f32.mrb[31].mxu0 }
 0x115   :  { %v313_v48 = vadd.f32 %v312_v45, %v2721_v47 }
 0x117   :  { %v314_v54 = vadd.f32 %v2710_v41, %v313_v48 }
 0x119   :  { %v315_v56 = vadd.f32 %v2719_v46, %v314_v54 }
 0x11b   :  { %v316_v61 = vrot.slane %v315_v56, 4 }
 0x11d   :  { %v317_v62 = vadd.f32 %v316_v61, %v315_v56 }
 0x11f   :  { %v318_v2 = vrot.slane %v317_v62, 2 }
 0x121   :  { %v319_v5 = vadd.f32 %v318_v2, %v317_v62 }
 0x123   :  { %v320_v8 = vrot.slane %v319_v5, 1 }
 0x125   :  { %v321_v13 = vadd.f32 %v320_v8, %v319_v5 }
 0x127   :  { %v2741_v14 = vmul.f32 0.00390625, %v321_v13 }
 0x129   :  { %v323_v16 = vsub.f32 %v2623_v50, %v2741_v14  ;;  %v324_v18 = vsub.f32 %v2627_v52, %v2741_v14  ;;  %v325_v21 = vsub.f32 %v2621_v49, %v2741_v14  ;;  %v326_v26 = vsub.f32 %v2625_v51, %v2741_v14 }
 0x12a   :  { %v327_v29 = vsub.f32 %v2635_v57, %v2741_v14  ;;  %v328_v34 = vsub.f32 %v2640_v60, %v2741_v14  ;;  %v329_v39 = vsub.f32 %v2632_v55, %v2741_v14  ;;  %v330_v44 = vsub.f32 %v2638_v59, %v2741_v14 }
 0x12b   :  { %v355_v22 = vmul.f32 %v323_v16, %v323_v16  ;;  %v356_v24 = vmul.f32 %v324_v18, %v324_v18  ;;  %v357_v30 = vmul.f32 %v325_v21, %v325_v21  ;;  %v358_v35 = vmul.f32 %v326_v26, %v326_v26 }
 0x12c   :  { %v359_v40 = vmul.f32 %v327_v29, %v327_v29  ;;  %v360_v45 = vmul.f32 %v328_v34, %v328_v34  ;;  %v331_v53 = vsub.f32 %v2647_v1, %v2741_v14  ;;  %v361_v54 = vmul.f32 %v329_v39, %v329_v39 }
 0x12d   :  { %v387_v32 = vadd.f32 %v356_v24, %v355_v22  ;;  %v332_v58 = vsub.f32 %v2652_v4, %v2741_v14  ;;  %v362_v61 = vmul.f32 %v330_v44, %v330_v44  ;;  %v333_v0 = vsub.f32 %v2644_v63, %v2741_v14 }
 0x12e   :  { %v363_v2 = vmul.f32 %v331_v53, %v331_v53  ;;  %v334_v6 = vsub.f32 %v2650_v3, %v2741_v14  ;;  %v335_v13 = vsub.f32 %v2659_v9, %v2741_v14  ;;  %v336_v21 = vsub.f32 %v2664_v12, %v2741_v14 }
 0x12f   :  { %v388_v38 = vadd.f32 %v387_v32, %v357_v30  ;;  %v364_v8 = vmul.f32 %v332_v58, %v332_v58  ;;  %v365_v16 = vmul.f32 %v333_v0, %v333_v0  ;;  %v337_v26 = vsub.f32 %v2656_v7, %v2741_v14 }
 0x130   :  { %v366_v22 = vmul.f32 %v334_v6, %v334_v6  ;;  %v367_v29 = vmul.f32 %v335_v13, %v335_v13  ;;  %v338_v32 = vsub.f32 %v2662_v11, %v2741_v14  ;;  %v368_v34 = vmul.f32 %v336_v21, %v336_v21 }
 0x131   :  { %v389_v42 = vadd.f32 %v388_v38, %v358_v35  ;;  %v339_v38 = vsub.f32 %v2671_v17, %v2741_v14  ;;  %v369_v39 = vmul.f32 %v337_v26, %v337_v26 }
 0x132   :  { %v370_v44 = vmul.f32 %v338_v32, %v338_v32 }
 0x133   :  { %v390_v48 = vadd.f32 %v389_v42, %v359_v40  ;;  %v340_v42 = vsub.f32 %v2676_v20, %v2741_v14  ;;  %v371_v53 = vmul.f32 %v339_v38, %v339_v38 }
 0x135   :  { %v391_v56 = vadd.f32 %v390_v48, %v360_v45  ;;  %v341_v48 = vsub.f32 %v2668_v15, %v2741_v14  ;;  %v372_v58 = vmul.f32 %v340_v42, %v340_v42 }
 0x137   :  { %v392_v62 = vadd.f32 %v391_v56, %v361_v54  ;;  %v342_v56 = vsub.f32 %v2674_v19, %v2741_v14  ;;  %v373_v0 = vmul.f32 %v341_v48, %v341_v48 }
 0x139   :  { %v393_v5 = vadd.f32 %v392_v62, %v362_v61  ;;  %v343_v62 = vsub.f32 %v2683_v25, %v2741_v14  ;;  %v374_v6 = vmul.f32 %v342_v56, %v342_v56 }
 0x13b   :  { %v394_v10 = vadd.f32 %v393_v5, %v363_v2  ;;  %v344_v5 = vsub.f32 %v2688_v28, %v2741_v14  ;;  %v375_v13 = vmul.f32 %v343_v62, %v343_v62 }
 0x13d   :  { %v395_v18 = vadd.f32 %v394_v10, %v364_v8  ;;  %v345_v10 = vsub.f32 %v2680_v23, %v2741_v14  ;;  %v376_v21 = vmul.f32 %v344_v5, %v344_v5 }
 0x13f   :  { %v396_v24 = vadd.f32 %v395_v18, %v365_v16  ;;  %v346_v18 = vsub.f32 %v2686_v27, %v2741_v14  ;;  %v377_v26 = vmul.f32 %v345_v10, %v345_v10 }
 0x141   :  { %v397_v30 = vadd.f32 %v396_v24, %v366_v22  ;;  %v347_v24 = vsub.f32 %v2695_v33, %v2741_v14  ;;  %v378_v32 = vmul.f32 %v346_v18, %v346_v18 }
 0x143   :  { %v398_v35 = vadd.f32 %v397_v30, %v367_v29  ;;  %v348_v30 = vsub.f32 %v2703_v37, %v2741_v14  ;;  %v379_v38 = vmul.f32 %v347_v24, %v347_v24 }
 0x145   :  { %v399_v40 = vadd.f32 %v398_v35, %v368_v34  ;;  %v349_v35 = vsub.f32 %v2692_v31, %v2741_v14  ;;  %v380_v42 = vmul.f32 %v348_v30, %v348_v30 }
 0x147   :  { %v400_v45 = vadd.f32 %v399_v40, %v369_v39  ;;  %v350_v40 = vsub.f32 %v2701_v36, %v2741_v14  ;;  %v381_v48 = vmul.f32 %v349_v35, %v349_v35  ;;  %v432_v35 = vlaneseq }
 0x149   :  { %v401_v54 = vadd.f32 %v400_v45, %v370_v44  ;;  %v351_v45 = vsub.f32 %v2713_v43, %v2741_v14  ;;  %v382_v56 = vmul.f32 %v350_v40, %v350_v40 }
 0x14b   :  { %v402_v61 = vadd.f32 %v401_v54, %v371_v53  ;;  %v352_v54 = vsub.f32 %v2721_v47, %v2741_v14  ;;  %v383_v62 = vmul.f32 %v351_v45, %v351_v45  ;;  %v429_v45 = vld [vmem:[%s3568_s3 + $0x4] sm:$0x1] }
 0x14d   :  { %v403_v2 = vadd.f32 %v402_v61, %v372_v58  ;;  %v353_v61 = vsub.f32 %v2710_v41, %v2741_v14  ;;  %v384_v5 = vmul.f32 %v352_v54, %v352_v54 }
 0x14f   :  { %v404_v8 = vadd.f32 %v403_v2, %v373_v0  ;;  %v354_v2 = vsub.f32 %v2719_v46, %v2741_v14 }
 0x151   :  { %v405_v16 = vadd.f32 %v404_v8, %v374_v6  ;;  %v385_v8 = vmul.f32 %v353_v61, %v353_v61 }
 0x153   :  { %v406_v22 = vadd.f32 %v405_v16, %v375_v13  ;;  %v386_v13 = vmul.f32 %v354_v2, %v354_v2 }
 0x155   :  { %v407_v29 = vadd.f32 %v406_v22, %v376_v21 }
 0x157   :  { %v408_v34 = vadd.f32 %v407_v29, %v377_v26 }
 0x159   :  { %v409_v39 = vadd.f32 %v408_v34, %v378_v32 }
 0x15b   :  { %v410_v44 = vadd.f32 %v409_v39, %v379_v38  ;;  %v433_v38 = vshrl.u32 %v432_v35, 7  ;;  %v425_v39 = vld [vmem:[%s3568_s3] sm:$0x1] }
 0x15d   :  { %v411_v53 = vadd.f32 %v410_v44, %v380_v42  ;;  %v2810_v40 = vsub.s32 0, %v433_v38 }
 0x15f   :  { %v412_v58 = vadd.f32 %v411_v53, %v381_v48 }
 0x161   :  { %v413_v0 = vadd.f32 %v412_v58, %v382_v56 }
 0x163   :  { %v414_v6 = vadd.f32 %v413_v0, %v383_v62 }
 0x165   :  { %v415_v10 = vadd.f32 %v414_v6, %v384_v5 }
 0x167   :  { %v416_v16 = vadd.f32 %v415_v10, %v385_v8 }
 0x169   :  { %v417_v18 = vadd.f32 %v416_v16, %v386_v13 }
 0x16b   :  { %v418_v21 = vrot.slane %v417_v18, 4 }
 0x16d   :  { %v419_v22 = vadd.f32 %v418_v21, %v417_v18 }
 0x16f   :  { %v420_v24 = vrot.slane %v419_v22, 2 }
 0x171   :  { %v421_v26 = vadd.f32 %v420_v24, %v419_v22 }
 0x173   :  { %v422_v29 = vrot.slane %v421_v26, 1 }
 0x175   :  { %v423_v30 = vadd.f32 %v422_v29, %v421_v26 }
 0x177   :  { %v424_v32 = vmul.f32 0.00390625, %v423_v30 }
 0x179   :  { %v426_v34 = vadd.f32 1e-05, %v424_v32 }
 0x17b   :  { %2446 = vrsqrt.f32 %v426_v34 }
 0x185   :  { %v2447_v42 = vpop.eup %2446 }
 0x186   :  { %v428_v44 = vmul.f32 %v2447_v42, %v425_v39 }
 0x188   :  { %v430_v48 = vmul.f32 %v428_v44, %v2741_v14  ;;  %v435_v53 = vrot.slane %v428_v44, %v2810_v40 }
 0x18a   :  { %v431_v54 = vsub.f32 %v429_v45, %v430_v48  ;;  %v465_v56 = vmul.f32 %v435_v53, %v2721_v47  ;;  %v436_v58 = vmul.f32 %v435_v53, %v2623_v50  ;;  %v437_v61 = vmul.f32 %v435_v53, %v2627_v52 }
 0x18b   :  { %v438_v62 = vmul.f32 %v2621_v49, %v435_v53  ;;  %v439_v0 = vmul.f32 %v2625_v51, %v435_v53  ;;  %v440_v2 = vmul.f32 %v435_v53, %v2635_v57  ;;  %v441_v5 = vmul.f32 %v435_v53, %v2640_v60 }
 0x18c   :  { %v471_v6 = vrot.slane %v431_v54, %v2810_v40  ;;  %v442_v14 = vmul.f32 %v2632_v55, %v435_v53  ;;  %v443_v8 = vmul.f32 %v2638_v59, %v435_v53  ;;  %v444_v47 = vmul.f32 %v435_v53, %v2647_v1 }
 0x18d   :  { %v445_v50 = vmul.f32 %v435_v53, %v2652_v4  ;;  %v446_v52 = vmul.f32 %v2644_v63, %v435_v53  ;;  %v447_v49 = vmul.f32 %v2650_v3, %v435_v53  ;;  %v448_v51 = vmul.f32 %v435_v53, %v2659_v9 }
 0x18e   :  { %v2832_v10 = vadd.f32 %v471_v6, %v465_v56  ;;  %v449_v57 = vmul.f32 %v435_v53, %v2664_v12  ;;  %v450_v60 = vmul.f32 %v2656_v7, %v435_v53  ;;  %v451_v55 = vmul.f32 %v2662_v11, %v435_v53 }
 0x18f   :  { %v452_v59 = vmul.f32 %v435_v53, %v2671_v17  ;;  %v453_v1 = vmul.f32 %v435_v53, %v2676_v20  ;;  %v454_v4 = vmul.f32 %v2668_v15, %v435_v53  ;;  %v455_v63 = vmul.f32 %v2674_v19, %v435_v53 }
 0x190   :  { %v456_v3 = vmul.f32 %v435_v53, %v2683_v25  ;;  %v457_v9 = vmul.f32 %v435_v53, %v2688_v28  ;;  %v458_v13 = vmul.f32 %v2680_v23, %v435_v53  ;;  %v459_v12 = vmul.f32 %v2686_v27, %v435_v53 }
 0x191   :  { %v460_v7 = vmul.f32 %v435_v53, %v2695_v33  ;;  %v461_v11 = vmul.f32 %v435_v53, %v2703_v37  ;;  %v462_v17 = vmul.f32 %v2692_v31, %v435_v53  ;;  %v463_v20 = vmul.f32 %v2701_v36, %v435_v53 }
 0x192   :  { %v464_v15 = vmul.f32 %v435_v53, %v2713_v43  ;;  %v466_v19 = vmul.f32 %v2710_v41, %v435_v53  ;;  %v467_v25 = vmul.f32 %v2719_v46, %v435_v53  ;;  %v474_v16 = vadd.f32 %v471_v6, %v438_v62 }
 0x193   :  { %v475_v28 = vadd.f32 %v471_v6, %v439_v0  ;;  %v476_v18 = vadd.f32 %v471_v6, %v440_v2  ;;  %v477_v23 = vadd.f32 %v471_v6, %v441_v5  ;;  %v478_v21 = vadd.f32 %v471_v6, %v442_v14 }
 0x194   :  { %v479_v27 = vadd.f32 %v471_v6, %v443_v8  ;;  %v480_v22 = vadd.f32 %v471_v6, %v444_v47  ;;  %v481_v33 = vadd.f32 %v471_v6, %v445_v50  ;;  %v482_v24 = vadd.f32 %v471_v6, %v446_v52 }
 0x195   :  { %v483_v37 = vadd.f32 %v471_v6, %v447_v49  ;;  %v484_v26 = vadd.f32 %v471_v6, %v448_v51  ;;  %v485_v31 = vadd.f32 %v471_v6, %v449_v57  ;;  %v486_v29 = vadd.f32 %v471_v6, %v450_v60 }
 0x196   :  { %v487_v36 = vadd.f32 %v471_v6, %v451_v55  ;;  %v488_v30 = vadd.f32 %v471_v6, %v452_v59  ;;  %v489_v43 = vadd.f32 %v471_v6, %v453_v1  ;;  %v490_v32 = vadd.f32 %v471_v6, %v454_v4 }
 0x197   :  { %v491_v41 = vadd.f32 %v471_v6, %v455_v63  ;;  %v492_v34 = vadd.f32 %v471_v6, %v456_v3  ;;  %v493_v46 = vadd.f32 %v471_v6, %v457_v9  ;;  %v494_v35 = vadd.f32 %v471_v6, %v458_v13 }
 0x198   :  { %v495_v38 = vadd.f32 %v471_v6, %v459_v12  ;;  %v496_v39 = vadd.f32 %v471_v6, %v460_v7  ;;  %v497_v42 = vadd.f32 %v471_v6, %v461_v11  ;;  %v498_v44 = vadd.f32 %v471_v6, %v462_v17 }
 0x199   :  { %v499_v45 = vadd.f32 %v471_v6, %v463_v20  ;;  %v500_v48 = vadd.f32 %v471_v6, %v464_v15  ;;  %v502_v53 = vadd.f32 %v471_v6, %v466_v19  ;;  %v503_v54 = vadd.f32 %v471_v6, %v467_v25 }
 0x19a   :  { %v472_v56 = vadd.f32 %v471_v6, %v436_v58  ;;  %v473_v62 = vadd.f32 %v471_v6, %v437_v61  ;;  %v506_v0 = vmax.f32 %v474_v16, 0.0  ;;  %v507_v2 = vmax.f32 %v475_v28, 0.0 }
 0x19b   :  { %v508_v5 = vmax.f32 %v476_v18, 0.0  ;;  %v509_v14 = vmax.f32 %v477_v23, 0.0  ;;  %v510_v8 = vmax.f32 %v478_v21, 0.0  ;;  %v511_v47 = vmax.f32 %v479_v27, 0.0 }
 0x19c   :  { %v504_v50 = vmax.f32 %v472_v56, 0.0  ;;  %v505_v52 = vmax.f32 %v473_v62, 0.0  ;;  %v537_v49 = vpack.c.bf16 %v507_v2, %v506_v0  ;;  %v512_v51 = vmax.f32 %v480_v22, 0.0 }
 0x19d   :  { %v538_v57 = vpack.c.bf16 %v509_v14, %v508_v5  ;;  %v539_v60 = vpack.c.bf16 %v511_v47, %v510_v8  ;;  %v513_v55 = vmax.f32 %v481_v33, 0.0  ;;  %v514_v59 = vmax.f32 %v482_v24, 0.0 }
 0x19e   :  { %v536_v1 = vpack.c.bf16 %v505_v52, %v504_v50  ;;  %v515_v4 = vmax.f32 %v483_v37, 0.0  ;;  %v516_v63 = vmax.f32 %v484_v26, 0.0  ;;  %v517_v3 = vmax.f32 %v485_v31, 0.0 }
 0x19f   :  { %v540_v58 = vpack.c.bf16 %v513_v55, %v512_v51  ;;  %v518_v61 = vmax.f32 %v486_v29, 0.0  ;;  %v519_v6 = vmax.f32 %v487_v36, 0.0  ;;  %v520_v9 = vmax.f32 %v488_v30, 0.0 }
 0x1a0   :  { %2274 = vmatprep.mubr.bf16.mxu1 %v536_v1  ;;  %v541_v13 = vpack.c.bf16 %v515_v4, %v514_v59  ;;  %v542_v12 = vpack.c.bf16 %v517_v3, %v516_v63  ;;  %v521_v7 = vmax.f32 %v489_v43, 0.0  ;;  %v522_v11 = vmax.f32 %v490_v32, 0.0 }
 0x1a1   :  { %2275 = vmatmul.mubr.bf16.vlgmr.msra.gmra.mrb[0].mxu1 %v537_v49  ;;  %v543_v17 = vpack.c.bf16 %v519_v6, %v518_v61  ;;  %v523_v20 = vmax.f32 %v491_v41, 0.0  ;;  %v524_v15 = vmax.f32 %v492_v34, 0.0  ;;  %v525_v19 = vmax.f32 %v493_v46, 0.0 }
 0x1a2   :  { %2278 = vmatprep.mubr.bf16.mxu1 %v538_v57  ;;  %v544_v25 = vpack.c.bf16 %v521_v7, %v520_v9  ;;  %v526_v16 = vmax.f32 %v494_v35, 0.0  ;;  %v527_v28 = vmax.f32 %v495_v38, 0.0  ;;  %v528_v18 = vmax.f32 %v496_v39, 0.0 }
 0x1a3   :  { %v545_v23 = vpack.c.bf16 %v523_v20, %v522_v11  ;;  %v546_v21 = vpack.c.bf16 %v525_v19, %v524_v15  ;;  %v529_v27 = vmax.f32 %v497_v42, 0.0  ;;  %v530_v22 = vmax.f32 %v498_v44, 0.0 }
 0x1a4   :  { %v547_v33 = vpack.c.bf16 %v527_v28, %v526_v16  ;;  %v531_v24 = vmax.f32 %v499_v45, 0.0  ;;  %v532_v37 = vmax.f32 %v500_v48, 0.0  ;;  %v533_v26 = vmax.f32 %v2832_v10, 0.0 }
 0x1a5   :  { %v548_v31 = vpack.c.bf16 %v529_v27, %v528_v18  ;;  %v534_v29 = vmax.f32 %v502_v53, 0.0  ;;  %v535_v36 = vmax.f32 %v503_v54, 0.0  ;;  %v2430_v27 = vld [vmem:[%s3567_s2 + $0x40] sm:$0xff]  }
 0x1a6   :  { %v549_v30 = vpack.c.bf16 %v531_v24, %v530_v22  ;;  %v550_v43 = vpack.c.bf16 %v533_v26, %v532_v37  ;;  %2306 = vmatprep.subr.bf16.mxu0 %v2430_v27  ;;  %v2431_v37 = vld [vmem:[%s3567_s2 + $0x48] sm:$0xff]  }
 0x1a7   :  { %v551_v32 = vpack.c.bf16 %v535_v36, %v534_v29  ;;  %2307 = vmatpush3.bf16.msra.mxu0 %v2430_v27 }
 0x1a8   :  { %2308 = vmatprep.subr.bf16.mxu0 %v2431_v37 }
 0x1a9   :  { %2279 = vmatmul.mubr.bf16.gmra.mrb[4].mxu1 %v539_v60 }
 0x1aa   :  { %2282 = vmatprep.mubr.bf16.mxu1 %v540_v58 }
 0x1ab   :  { %2309 = vmatpush3.bf16.msra.mxu0 %v2431_v37 }
 0x1b1   :  { %2283 = vmatmul.mubr.bf16.gmra.mrb[8].mxu1 %v541_v13 }
 0x1b2   :  { %2286 = vmatprep.mubr.bf16.mxu1 %v542_v12 }
 0x1b9   :  { %2287 = vmatmul.mubr.bf16.gmra.mrb[12].mxu1 %v543_v17 }
 0x1ba   :  { %2290 = vmatprep.mubr.bf16.mxu1 %v544_v25 }
 0x1c1   :  { %2291 = vmatmul.mubr.bf16.gmra.mrb[16].mxu1 %v545_v23 }
 0x1c2   :  { %2294 = vmatprep.mubr.bf16.mxu1 %v546_v21 }
 0x1c9   :  { %2295 = vmatmul.mubr.bf16.gmra.mrb[20].mxu1 %v547_v33 }
 0x1ca   :  { %2298 = vmatprep.mubr.bf16.mxu1 %v548_v31 }
 0x1d1   :  { %2299 = vmatmul.mubr.bf16.gmra.mrb[24].mxu1 %v549_v30 }
 0x1d2   :  { %2302 = vmatprep.mubr.bf16.mxu1 %v550_v43  ;;  %v2432_v43 = vld [vmem:[%s3567_s2 + $0x50] sm:$0xff]  }
 0x1d3   :  { %2310 = vmatprep.subr.bf16.mxu0 %v2432_v43 }
 0x1d4   :  { %2311 = vmatpush3.bf16.msra.mxu0 %v2432_v43 }
 0x1d9   :  { %2303 = vmatmul.mubr.bf16.gmra.mrb[28].mxu1 %v551_v32 }
 0x274   :  { %v2853_v10 = vpop.f32.mrb[0].mxu1 }
 0x275   :  { %v2855_v41 = vpop.f32.mrb[1].mxu1 }
 0x276   :  { %v2857_v34 = vpop.f32.mrb[2].mxu1 }
 0x277   :  { %v2859_v46 = vpop.f32.mrb[3].mxu1 }
 0x278   :  { %v777_v35 = vadd.f32 %v2859_v46, %v2855_v41 }
 0x27a   :  { %v778_v38 = vadd.f32 %v2853_v10, %v777_v35 }
 0x27c   :  { %v2864_v39 = vpop.f32.mrb[4].mxu1  ;;  %v779_v42 = vadd.f32 %v2857_v34, %v778_v38 }
 0x27d   :  { %v2867_v44 = vpop.f32.mrb[5].mxu1 }
 0x27e   :  { %v780_v45 = vadd.f32 %v779_v42, %v2867_v44  ;;  %v2870_v48 = vpop.f32.mrb[6].mxu1  ;;  %v2433_v42 = vld [vmem:[%s3567_s2 + $0x58] sm:$0xff]  }
 0x27f   :  { %v2872_v53 = vpop.f32.mrb[7].mxu1  ;;  %2312 = vmatprep.subr.bf16.mxu0 %v2433_v42 }
 0x280   :  { %v781_v54 = vadd.f32 %v780_v45, %v2872_v53  ;;  %2313 = vmatpush3.bf16.msra.mxu0 %v2433_v42 }
 0x282   :  { %v782_v56 = vadd.f32 %v2864_v39, %v781_v54 }
 0x284   :  { %v2876_v62 = vpop.f32.mrb[8].mxu1  ;;  %v783_v0 = vadd.f32 %v2870_v48, %v782_v56  ;;  %v2434_v56 = vld [vmem:[%s3567_s2 + $0x60] sm:$0xff]  }
 0x285   :  { %v2879_v2 = vpop.f32.mrb[9].mxu1  ;;  %2314 = vmatprep.subr.bf16.mxu0 %v2434_v56 }
 0x286   :  { %v784_v5 = vadd.f32 %v783_v0, %v2879_v2  ;;  %v2882_v14 = vpop.f32.mrb[10].mxu1  ;;  %2315 = vmatpush3.bf16.msra.mxu0 %v2434_v56 }
 0x287   :  { %v2884_v8 = vpop.f32.mrb[11].mxu1 }
 0x288   :  { %v785_v47 = vadd.f32 %v784_v5, %v2884_v8 }
 0x28a   :  { %v786_v50 = vadd.f32 %v2876_v62, %v785_v47  ;;  %v2435_v47 = vld [vmem:[%s3567_s2 + $0x68] sm:$0xff]  }
 0x28b   :  { %2316 = vmatprep.subr.bf16.mxu0 %v2435_v47 }
 0x28c   :  { %v2888_v52 = vpop.f32.mrb[12].mxu1  ;;  %v787_v49 = vadd.f32 %v2882_v14, %v786_v50  ;;  %2317 = vmatpush3.bf16.msra.mxu0 %v2435_v47 }
 0x28d   :  { %v2891_v51 = vpop.f32.mrb[13].mxu1 }
 0x28e   :  { %v788_v57 = vadd.f32 %v787_v49, %v2891_v51  ;;  %v2894_v60 = vpop.f32.mrb[14].mxu1  ;;  %v2436_v49 = vld [vmem:[%s3567_s2 + $0x70] sm:$0xff]  }
 0x28f   :  { %v2896_v55 = vpop.f32.mrb[15].mxu1  ;;  %2318 = vmatprep.subr.bf16.mxu0 %v2436_v49 }
 0x290   :  { %v789_v59 = vadd.f32 %v788_v57, %v2896_v55  ;;  %2319 = vmatpush3.bf16.msra.mxu0 %v2436_v49 }
 0x292   :  { %v790_v1 = vadd.f32 %v2888_v52, %v789_v59  ;;  %v2437_v59 = vld [vmem:[%s3567_s2 + $0x78] sm:$0xff]  }
 0x293   :  { %2320 = vmatprep.subr.bf16.mxu0 %v2437_v59 }
 0x294   :  { %v2900_v4 = vpop.f32.mrb[16].mxu1  ;;  %v791_v63 = vadd.f32 %v2894_v60, %v790_v1  ;;  %2321 = vmatpush3.bf16.msra.mxu0 %v2437_v59 }
 0x295   :  { %v2903_v3 = vpop.f32.mrb[17].mxu1 }
 0x296   :  { %v792_v58 = vadd.f32 %v791_v63, %v2903_v3  ;;  %v2906_v61 = vpop.f32.mrb[18].mxu1 }
 0x297   :  { %v2908_v6 = vpop.f32.mrb[19].mxu1 }
 0x298   :  { %v793_v9 = vadd.f32 %v792_v58, %v2908_v6 }
 0x29a   :  { %v794_v13 = vadd.f32 %v2900_v4, %v793_v9 }
 0x29c   :  { %v2912_v12 = vpop.f32.mrb[20].mxu1  ;;  %v795_v7 = vadd.f32 %v2906_v61, %v794_v13 }
 0x29d   :  { %v2915_v11 = vpop.f32.mrb[21].mxu1 }
 0x29e   :  { %v796_v17 = vadd.f32 %v795_v7, %v2915_v11  ;;  %v2918_v20 = vpop.f32.mrb[22].mxu1 }
 0x29f   :  { %v2920_v15 = vpop.f32.mrb[23].mxu1 }
 0x2a0   :  { %v797_v19 = vadd.f32 %v796_v17, %v2920_v15 }
 0x2a2   :  { %v798_v25 = vadd.f32 %v2912_v12, %v797_v19 }
 0x2a4   :  { %v2924_v16 = vpop.f32.mrb[24].mxu1  ;;  %v799_v28 = vadd.f32 %v2918_v20, %v798_v25 }
 0x2a5   :  { %v2927_v18 = vpop.f32.mrb[25].mxu1 }
 0x2a6   :  { %v800_v23 = vadd.f32 %v799_v28, %v2927_v18  ;;  %v2930_v21 = vpop.f32.mrb[26].mxu1 }
 0x2a7   :  { %v2935_v22 = vpop.f32.mrb[27].mxu1 }
 0x2a8   :  { %v801_v33 = vadd.f32 %v800_v23, %v2935_v22 }
 0x2aa   :  { %v802_v24 = vadd.f32 %v2924_v16, %v801_v33 }
 0x2ac   :  { %v2942_v26 = vpop.f32.mrb[28].mxu1  ;;  %v803_v31 = vadd.f32 %v2930_v21, %v802_v24 }
 0x2ad   :  { %v2945_v29 = vpop.f32.mrb[29].mxu1 }
 0x2ae   :  { %v804_v36 = vadd.f32 %v803_v31, %v2945_v29  ;;  %v2948_v30 = vpop.f32.mrb[30].mxu1 }
 0x2af   :  { %v2953_v32 = vpop.f32.mrb[31].mxu1 }
 0x2b0   :  { %v805_v35 = vadd.f32 %v804_v36, %v2953_v32 }
 0x2b2   :  { %v806_v38 = vadd.f32 %v2942_v26, %v805_v35 }
 0x2b4   :  { %v807_v45 = vadd.f32 %v2948_v30, %v806_v38 }
 0x2b6   :  { %v808_v54 = vrot.slane %v807_v45, 4 }
 0x2b8   :  { %v809_v0 = vadd.f32 %v808_v54, %v807_v45 }
 0x2ba   :  { %v810_v5 = vrot.slane %v809_v0, 2 }
 0x2bc   :  { %v811_v50 = vadd.f32 %v810_v5, %v809_v0 }
 0x2be   :  { %v812_v57 = vrot.slane %v811_v50, 1 }
 0x2c0   :  { %v813_v1 = vadd.f32 %v812_v57, %v811_v50 }
 0x2c2   :  { %v2973_v63 = vmul.f32 0.00390625, %v813_v1 }
 0x2c4   :  { %v815_v58 = vsub.f32 %v2855_v41, %v2973_v63  ;;  %v816_v9 = vsub.f32 %v2859_v46, %v2973_v63  ;;  %v817_v13 = vsub.f32 %v2853_v10, %v2973_v63  ;;  %v818_v19 = vsub.f32 %v2857_v34, %v2973_v63 }
 0x2c5   :  { %v819_v25 = vsub.f32 %v2867_v44, %v2973_v63  ;;  %v820_v27 = vsub.f32 %v2872_v53, %v2973_v63  ;;  %v821_v37 = vsub.f32 %v2864_v39, %v2973_v63  ;;  %v822_v43 = vsub.f32 %v2870_v48, %v2973_v63 }
 0x2c6   :  { %v847_v7 = vmul.f32 %v815_v58, %v815_v58  ;;  %v848_v17 = vmul.f32 %v816_v9, %v816_v9  ;;  %v849_v28 = vmul.f32 %v817_v13, %v817_v13  ;;  %v850_v33 = vmul.f32 %v818_v19, %v818_v19 }
 0x2c7   :  { %v851_v31 = vmul.f32 %v819_v25, %v819_v25  ;;  %v852_v35 = vmul.f32 %v820_v27, %v820_v27  ;;  %v823_v42 = vsub.f32 %v2879_v2, %v2973_v63  ;;  %v853_v45 = vmul.f32 %v821_v37, %v821_v37 }
 0x2c8   :  { %v879_v23 = vadd.f32 %v848_v17, %v847_v7  ;;  %v824_v56 = vsub.f32 %v2884_v8, %v2973_v63  ;;  %v854_v0 = vmul.f32 %v822_v43, %v822_v43  ;;  %v825_v47 = vsub.f32 %v2876_v62, %v2973_v63 }
 0x2c9   :  { %v855_v50 = vmul.f32 %v823_v42, %v823_v42  ;;  %v826_v57 = vsub.f32 %v2882_v14, %v2973_v63  ;;  %v827_v58 = vsub.f32 %v2891_v51, %v2973_v63  ;;  %v828_v7 = vsub.f32 %v2896_v55, %v2973_v63 }
 0x2ca   :  { %v880_v24 = vadd.f32 %v879_v23, %v849_v28  ;;  %v856_v59 = vmul.f32 %v824_v56, %v824_v56  ;;  %v857_v9 = vmul.f32 %v825_v47, %v825_v47  ;;  %v829_v25 = vsub.f32 %v2888_v52, %v2973_v63 }
 0x2cb   :  { %v858_v17 = vmul.f32 %v826_v57, %v826_v57  ;;  %v859_v28 = vmul.f32 %v827_v58, %v827_v58  ;;  %v830_v27 = vsub.f32 %v2894_v60, %v2973_v63  ;;  %v831_v37 = vsub.f32 %v2903_v3, %v2973_v63 }
 0x2cc   :  { %v881_v36 = vadd.f32 %v880_v24, %v850_v33  ;;  %v860_v33 = vmul.f32 %v828_v7, %v828_v7  ;;  %v832_v43 = vsub.f32 %v2908_v6, %v2973_v63  ;;  %v833_v42 = vsub.f32 %v2900_v4, %v2973_v63 }
 0x2cd   :  { %v834_v56 = vsub.f32 %v2906_v61, %v2973_v63  ;;  %v835_v47 = vsub.f32 %v2915_v11, %v2973_v63  ;;  %v836_v57 = vsub.f32 %v2920_v15, %v2973_v63  ;;  %v837_v58 = vsub.f32 %v2912_v12, %v2973_v63 }
 0x2ce   :  { %v882_v38 = vadd.f32 %v881_v36, %v851_v31  ;;  %v861_v31 = vmul.f32 %v829_v25, %v829_v25  ;;  %v838_v7 = vsub.f32 %v2918_v20, %v2973_v63  ;;  %v839_v25 = vsub.f32 %v2927_v18, %v2973_v63 }
 0x2d0   :  { %v883_v54 = vadd.f32 %v882_v38, %v852_v35  ;;  %v862_v35 = vmul.f32 %v830_v27, %v830_v27  ;;  %v840_v27 = vsub.f32 %v2935_v22, %v2973_v63 }
 0x2d2   :  { %v884_v5 = vadd.f32 %v883_v54, %v853_v45  ;;  %v863_v45 = vmul.f32 %v831_v37, %v831_v37  ;;  %v841_v37 = vsub.f32 %v2924_v16, %v2973_v63 }
 0x2d4   :  { %v885_v49 = vadd.f32 %v884_v5, %v854_v0  ;;  %v864_v0 = vmul.f32 %v832_v43, %v832_v43  ;;  %v842_v43 = vsub.f32 %v2930_v21, %v2973_v63 }
 0x2d6   :  { %v886_v1 = vadd.f32 %v885_v49, %v855_v50  ;;  %v865_v50 = vmul.f32 %v833_v42, %v833_v42  ;;  %v843_v42 = vsub.f32 %v2945_v29, %v2973_v63 }
 0x2d8   :  { %v887_v13 = vadd.f32 %v886_v1, %v856_v59  ;;  %v866_v59 = vmul.f32 %v834_v56, %v834_v56  ;;  %v844_v56 = vsub.f32 %v2953_v32, %v2973_v63 }
 0x2da   :  { %v888_v19 = vadd.f32 %v887_v13, %v857_v9  ;;  %v867_v9 = vmul.f32 %v835_v47, %v835_v47  ;;  %v845_v47 = vsub.f32 %v2942_v26, %v2973_v63 }
 0x2dc   :  { %v889_v23 = vadd.f32 %v888_v19, %v858_v17  ;;  %v868_v17 = vmul.f32 %v836_v57, %v836_v57  ;;  %v846_v57 = vsub.f32 %v2948_v30, %v2973_v63 }
 0x2de   :  { %v890_v24 = vadd.f32 %v889_v23, %v859_v28  ;;  %v869_v28 = vmul.f32 %v837_v58, %v837_v58  ;;  %v877_v58 = vmul.f32 %v845_v47, %v845_v47 }
 0x2e0   :  { %v891_v36 = vadd.f32 %v890_v24, %v860_v33  ;;  %v870_v33 = vmul.f32 %v838_v7, %v838_v7 }
 0x2e2   :  { %v892_v38 = vadd.f32 %v891_v36, %v861_v31  ;;  %v871_v31 = vmul.f32 %v839_v25, %v839_v25 }
 0x2e4   :  { %v893_v54 = vadd.f32 %v892_v38, %v862_v35  ;;  %v872_v35 = vmul.f32 %v840_v27, %v840_v27 }
 0x2e6   :  { %v894_v5 = vadd.f32 %v893_v54, %v863_v45  ;;  %v873_v45 = vmul.f32 %v841_v37, %v841_v37 }
 0x2e8   :  { %v895_v49 = vadd.f32 %v894_v5, %v864_v0  ;;  %v874_v0 = vmul.f32 %v842_v43, %v842_v43 }
 0x2ea   :  { %v896_v1 = vadd.f32 %v895_v49, %v865_v50  ;;  %v875_v50 = vmul.f32 %v843_v42, %v843_v42 }
 0x2ec   :  { %v897_v13 = vadd.f32 %v896_v1, %v866_v59  ;;  %v876_v59 = vmul.f32 %v844_v56, %v844_v56 }
 0x2ee   :  { %v898_v19 = vadd.f32 %v897_v13, %v867_v9  ;;  %v878_v13 = vmul.f32 %v846_v57, %v846_v57 }
 0x2f0   :  { %v899_v23 = vadd.f32 %v898_v19, %v868_v17 }
 0x2f2   :  { %v900_v24 = vadd.f32 %v899_v23, %v869_v28 }
 0x2f4   :  { %v901_v36 = vadd.f32 %v900_v24, %v870_v33 }
 0x2f6   :  { %v902_v38 = vadd.f32 %v901_v36, %v871_v31  ;;  %v917_v31 = vld [vmem:[%s3568_s3 + $0x1] sm:$0x1] }
 0x2f8   :  { %v903_v54 = vadd.f32 %v902_v38, %v872_v35  ;;  %v921_v35 = vld [vmem:[%s3568_s3 + $0x5] sm:$0x1] }
 0x2fa   :  { %v904_v5 = vadd.f32 %v903_v54, %v873_v45 }
 0x2fc   :  { %v905_v49 = vadd.f32 %v904_v5, %v874_v0 }
 0x2fe   :  { %v906_v1 = vadd.f32 %v905_v49, %v875_v50 }
 0x300   :  { %v907_v9 = vadd.f32 %v906_v1, %v876_v59 }
 0x302   :  { %v908_v7 = vadd.f32 %v907_v9, %v877_v58 }
 0x304   :  { %v909_v17 = vadd.f32 %v908_v7, %v878_v13 }
 0x306   :  { %v910_v19 = vrot.slane %v909_v17, 4 }
 0x308   :  { %v911_v25 = vadd.f32 %v910_v19, %v909_v17 }
 0x30a   :  { %v912_v28 = vrot.slane %v911_v25, 2 }
 0x30c   :  { %v913_v23 = vadd.f32 %v912_v28, %v911_v25 }
 0x30e   :  { %v914_v27 = vrot.slane %v913_v23, 1 }
 0x310   :  { %v915_v33 = vadd.f32 %v914_v27, %v913_v23 }
 0x312   :  { %v916_v24 = vmul.f32 0.00390625, %v915_v33 }
 0x314   :  { %v918_v37 = vadd.f32 1e-05, %v916_v24 }
 0x316   :  { %2448 = vrsqrt.f32 %v918_v37 }
 0x320   :  { %v2449_v36 = vpop.eup %2448 }
 0x321   :  { %v920_v43 = vmul.f32 %v2449_v36, %v917_v31 }
 0x323   :  { %v922_v38 = vmul.f32 %v920_v43, %v2973_v63  ;;  %v927_v42 = vrot.slane %v920_v43, %v2810_v40 }
 0x325   :  { %v923_v45 = vsub.f32 %v921_v35, %v922_v38  ;;  %v957_v54 = vmul.f32 %v927_v42, %v2953_v32  ;;  %v928_v56 = vmul.f32 %v927_v42, %v2855_v41  ;;  %v929_v0 = vmul.f32 %v927_v42, %v2859_v46 }
 0x326   :  { %v930_v5 = vmul.f32 %v2853_v10, %v927_v42  ;;  %v931_v47 = vmul.f32 %v2857_v34, %v927_v42  ;;  %v932_v50 = vmul.f32 %v927_v42, %v2867_v44  ;;  %v933_v49 = vmul.f32 %v927_v42, %v2872_v53 }
 0x327   :  { %v963_v57 = vrot.slane %v923_v45, %v2810_v40  ;;  %v934_v63 = vmul.f32 %v2864_v39, %v927_v42  ;;  %v935_v59 = vmul.f32 %v2870_v48, %v927_v42  ;;  %v936_v32 = vmul.f32 %v927_v42, %v2879_v2 }
 0x328   :  { %v937_v41 = vmul.f32 %v927_v42, %v2884_v8  ;;  %v938_v46 = vmul.f32 %v2876_v62, %v927_v42  ;;  %v939_v10 = vmul.f32 %v2882_v14, %v927_v42  ;;  %v940_v34 = vmul.f32 %v927_v42, %v2891_v51 }
 0x329   :  { %v3062_v1 = vadd.f32 %v963_v57, %v957_v54  ;;  %v941_v44 = vmul.f32 %v927_v42, %v2896_v55  ;;  %v942_v53 = vmul.f32 %v2888_v52, %v927_v42  ;;  %v943_v39 = vmul.f32 %v2894_v60, %v927_v42 }
 0x32a   :  { %v944_v48 = vmul.f32 %v927_v42, %v2903_v3  ;;  %v945_v2 = vmul.f32 %v927_v42, %v2908_v6  ;;  %v946_v8 = vmul.f32 %v2900_v4, %v927_v42  ;;  %v947_v62 = vmul.f32 %v2906_v61, %v927_v42 }
 0x32b   :  { %v948_v14 = vmul.f32 %v927_v42, %v2915_v11  ;;  %v949_v51 = vmul.f32 %v927_v42, %v2920_v15  ;;  %v950_v58 = vmul.f32 %v2912_v12, %v927_v42  ;;  %v951_v55 = vmul.f32 %v2918_v20, %v927_v42 }
 0x32c   :  { %v952_v52 = vmul.f32 %v927_v42, %v2927_v18  ;;  %v953_v60 = vmul.f32 %v927_v42, %v2935_v22  ;;  %v954_v3 = vmul.f32 %v2924_v16, %v927_v42  ;;  %v955_v6 = vmul.f32 %v2930_v21, %v927_v42 }
 0x32d   :  { %v956_v4 = vmul.f32 %v927_v42, %v2945_v29  ;;  %v958_v61 = vmul.f32 %v2942_v26, %v927_v42  ;;  %v959_v11 = vmul.f32 %v2948_v30, %v927_v42  ;;  %v964_v9 = vadd.f32 %v963_v57, %v928_v56 }
 0x32e   :  { %v965_v15 = vadd.f32 %v963_v57, %v929_v0  ;;  %v966_v13 = vadd.f32 %v963_v57, %v930_v5  ;;  %v967_v12 = vadd.f32 %v963_v57, %v931_v47  ;;  %v968_v7 = vadd.f32 %v963_v57, %v932_v50 }
 0x32f   :  { %v969_v20 = vadd.f32 %v963_v57, %v933_v49  ;;  %v970_v17 = vadd.f32 %v963_v57, %v934_v63  ;;  %v971_v18 = vadd.f32 %v963_v57, %v935_v59  ;;  %v972_v19 = vadd.f32 %v963_v57, %v936_v32 }
 0x330   :  { %v973_v22 = vadd.f32 %v963_v57, %v937_v41  ;;  %v974_v25 = vadd.f32 %v963_v57, %v938_v46  ;;  %v975_v16 = vadd.f32 %v963_v57, %v939_v10  ;;  %v976_v28 = vadd.f32 %v963_v57, %v940_v34 }
 0x331   :  { %v977_v21 = vadd.f32 %v963_v57, %v941_v44  ;;  %v978_v23 = vadd.f32 %v963_v57, %v942_v53  ;;  %v979_v29 = vadd.f32 %v963_v57, %v943_v39  ;;  %v980_v27 = vadd.f32 %v963_v57, %v944_v48 }
 0x332   :  { %v981_v26 = vadd.f32 %v963_v57, %v945_v2  ;;  %v982_v33 = vadd.f32 %v963_v57, %v946_v8  ;;  %v983_v30 = vadd.f32 %v963_v57, %v947_v62  ;;  %v984_v24 = vadd.f32 %v963_v57, %v948_v14 }
 0x333   :  { %v985_v37 = vadd.f32 %v963_v57, %v949_v51  ;;  %v986_v31 = vadd.f32 %v963_v57, %v950_v58  ;;  %v987_v36 = vadd.f32 %v963_v57, %v951_v55  ;;  %v988_v43 = vadd.f32 %v963_v57, %v952_v52 }
 0x334   :  { %v989_v35 = vadd.f32 %v963_v57, %v953_v60  ;;  %v990_v38 = vadd.f32 %v963_v57, %v954_v3  ;;  %v991_v42 = vadd.f32 %v963_v57, %v955_v6  ;;  %v992_v45 = vadd.f32 %v963_v57, %v956_v4 }
 0x335   :  { %v994_v54 = vadd.f32 %v963_v57, %v958_v61  ;;  %v995_v56 = vadd.f32 %v963_v57, %v959_v11  ;;  %v998_v0 = vmax.f32 %v966_v13, 0.0  ;;  %v999_v5 = vmax.f32 %v967_v12, 0.0 }
 0x336   :  { %v996_v47 = vmax.f32 %v964_v9, 0.0  ;;  %v997_v50 = vmax.f32 %v965_v15, 0.0  ;;  %v1000_v49 = vmax.f32 %v968_v7, 0.0  ;;  %v1001_v63 = vmax.f32 %v969_v20, 0.0 }
 0x337   :  { %v1029_v59 = vpack.c.bf16 %v999_v5, %v998_v0  ;;  %v1002_v32 = vmax.f32 %v970_v17, 0.0  ;;  %v1003_v41 = vmax.f32 %v971_v18, 0.0  ;;  %v1004_v46 = vmax.f32 %v972_v19, 0.0 }
 0x338   :  { %v1028_v10 = vpack.c.bf16 %v997_v50, %v996_v47  ;;  %v1030_v34 = vpack.c.bf16 %v1001_v63, %v1000_v49  ;;  %v1005_v44 = vmax.f32 %v973_v22, 0.0  ;;  %v1006_v53 = vmax.f32 %v974_v25, 0.0 }
 0x339   :  { %v1031_v39 = vpack.c.bf16 %v1003_v41, %v1002_v32  ;;  %v1007_v48 = vmax.f32 %v975_v16, 0.0  ;;  %v1008_v2 = vmax.f32 %v976_v28, 0.0  ;;  %v1009_v8 = vmax.f32 %v977_v21, 0.0 }
 0x33a   :  { %2322 = vmatprep.mubr.bf16.mxu0 %v1028_v10  ;;  %v1032_v57 = vpack.c.bf16 %v1005_v44, %v1004_v46  ;;  %v1010_v62 = vmax.f32 %v978_v23, 0.0  ;;  %v1011_v14 = vmax.f32 %v979_v29, 0.0  ;;  %v1012_v51 = vmax.f32 %v980_v27, 0.0 }
 0x33b   :  { %2323 = vmatmul.mubr.bf16.vlgmr.msra.gmra.mrb[32].mxu0 %v1029_v59  ;;  %v1033_v58 = vpack.c.bf16 %v1007_v48, %v1006_v53  ;;  %v1034_v55 = vpack.c.bf16 %v1009_v8, %v1008_v2  ;;  %v1013_v52 = vmax.f32 %v981_v26, 0.0  ;;  %v1014_v60 = vmax.f32 %v982_v33, 0.0 }
 0x33c   :  { %2326 = vmatprep.mubr.bf16.mxu0 %v1030_v34  ;;  %v1035_v3 = vpack.c.bf16 %v1011_v14, %v1010_v62  ;;  %v1015_v6 = vmax.f32 %v983_v30, 0.0  ;;  %v1016_v4 = vmax.f32 %v984_v24, 0.0  ;;  %v1017_v61 = vmax.f32 %v985_v37, 0.0 }
 0x33d   :  { %v1036_v11 = vpack.c.bf16 %v1013_v52, %v1012_v51  ;;  %v1018_v9 = vmax.f32 %v986_v31, 0.0  ;;  %v1019_v15 = vmax.f32 %v987_v36, 0.0  ;;  %v1020_v13 = vmax.f32 %v988_v43, 0.0 }
 0x33e   :  { %v1037_v12 = vpack.c.bf16 %v1015_v6, %v1014_v60  ;;  %v1038_v7 = vpack.c.bf16 %v1017_v61, %v1016_v4  ;;  %v1021_v20 = vmax.f32 %v989_v35, 0.0  ;;  %v1022_v17 = vmax.f32 %v990_v38, 0.0 }
 0x33f   :  { %v1039_v18 = vpack.c.bf16 %v1019_v15, %v1018_v9  ;;  %v1023_v19 = vmax.f32 %v991_v42, 0.0  ;;  %v1024_v22 = vmax.f32 %v992_v45, 0.0  ;;  %v1025_v25 = vmax.f32 %v3062_v1, 0.0 }
 0x340   :  { %v1040_v16 = vpack.c.bf16 %v1021_v20, %v1020_v13  ;;  %v1026_v28 = vmax.f32 %v994_v54, 0.0  ;;  %v1027_v21 = vmax.f32 %v995_v56, 0.0  ;;  %v2438_v20 = vld [vmem:[%s3567_s2 + $0x80] sm:$0xff]  }
 0x341   :  { %v1041_v23 = vpack.c.bf16 %v1023_v19, %v1022_v17  ;;  %v1042_v29 = vpack.c.bf16 %v1025_v25, %v1024_v22  ;;  %2354 = vmatprep.subr.bf16.mxu0 %v2438_v20  ;;  %2402 = vmatprep.subr.bf16.mxu1 %v2438_v20  ;;  %v2439_v22 = vld [vmem:[%s3567_s2 + $0x88] sm:$0xff]  }
 0x342   :  { %v1043_v27 = vpack.c.bf16 %v1027_v21, %v1026_v28  ;;  %2355 = vmatpush3.bf16.msra.mxu0 %v2438_v20  ;;  %2410 = vmatpush3.bf16.msra.mxu1 %v2438_v20 }
 0x343   :  { %2327 = vmatmul.mubr.bf16.gmra.mrb[36].mxu0 %v1031_v39  ;;  %2356 = vmatprep.subr.bf16.mxu0 %v2439_v22 }
 0x344   :  { %2330 = vmatprep.mubr.bf16.mxu0 %v1032_v57  ;;  %2403 = vmatprep.subr.bf16.mxu1 %v2439_v22 }
 0x346   :  { %2357 = vmatpush3.bf16.msra.mxu0 %v2439_v22  ;;  %2411 = vmatpush3.bf16.msra.mxu1 %v2439_v22 }
 0x34b   :  { %2331 = vmatmul.mubr.bf16.gmra.mrb[40].mxu0 %v1033_v58 }
 0x34c   :  { %2334 = vmatprep.mubr.bf16.mxu0 %v1034_v55 }
 0x353   :  { %2335 = vmatmul.mubr.bf16.gmra.mrb[44].mxu0 %v1035_v3 }
 0x354   :  { %2338 = vmatprep.mubr.bf16.mxu0 %v1036_v11 }
 0x35b   :  { %2339 = vmatmul.mubr.bf16.gmra.mrb[48].mxu0 %v1037_v12 }
 0x35c   :  { %2342 = vmatprep.mubr.bf16.mxu0 %v1038_v7 }
 0x363   :  { %2343 = vmatmul.mubr.bf16.gmra.mrb[52].mxu0 %v1039_v18 }
 0x364   :  { %2346 = vmatprep.mubr.bf16.mxu0 %v1040_v16 }
 0x36b   :  { %2347 = vmatmul.mubr.bf16.gmra.mrb[56].mxu0 %v1041_v23 }
 0x36c   :  { %2350 = vmatprep.mubr.bf16.mxu0 %v1042_v29  ;;  %v2440_v29 = vld [vmem:[%s3567_s2 + $0x90] sm:$0xff]  }
 0x36d   :  { %2358 = vmatprep.subr.bf16.mxu0 %v2440_v29  ;;  %2404 = vmatprep.subr.bf16.mxu1 %v2440_v29 }
 0x36e   :  { %2359 = vmatpush3.bf16.msra.mxu0 %v2440_v29  ;;  %2412 = vmatpush3.bf16.msra.mxu1 %v2440_v29 }
 0x373   :  { %2351 = vmatmul.mubr.bf16.gmra.mrb[60].mxu0 %v1043_v27 }
 0x40e   :  { %v3083_v1 = vpop.f32.mrb[32].mxu0 }
 0x40f   :  { %v3085_v26 = vpop.f32.mrb[33].mxu0 }
 0x410   :  { %v3087_v33 = vpop.f32.mrb[34].mxu0 }
 0x411   :  { %v3089_v30 = vpop.f32.mrb[35].mxu0 }
 0x412   :  { %v1270_v24 = vadd.f32 %v3089_v30, %v3085_v26 }
 0x414   :  { %v1271_v37 = vadd.f32 %v3083_v1, %v1270_v24 }
 0x416   :  { %v3094_v31 = vpop.f32.mrb[36].mxu0  ;;  %v1272_v36 = vadd.f32 %v3087_v33, %v1271_v37 }
 0x417   :  { %v3097_v43 = vpop.f32.mrb[37].mxu0 }
 0x418   :  { %v1273_v35 = vadd.f32 %v1272_v36, %v3097_v43  ;;  %v3100_v38 = vpop.f32.mrb[38].mxu0  ;;  %v2441_v36 = vld [vmem:[%s3567_s2 + $0x98] sm:$0xff]  }
 0x419   :  { %v3102_v42 = vpop.f32.mrb[39].mxu0  ;;  %2360 = vmatprep.subr.bf16.mxu0 %v2441_v36  ;;  %2405 = vmatprep.subr.bf16.mxu1 %v2441_v36 }
 0x41a   :  { %v1274_v45 = vadd.f32 %v1273_v35, %v3102_v42  ;;  %2361 = vmatpush3.bf16.msra.mxu0 %v2441_v36  ;;  %2413 = vmatpush3.bf16.msra.mxu1 %v2441_v36 }
 0x41c   :  { %v1275_v54 = vadd.f32 %v3094_v31, %v1274_v45 }
 0x41e   :  { %v3106_v56 = vpop.f32.mrb[40].mxu0  ;;  %v1276_v0 = vadd.f32 %v3100_v38, %v1275_v54  ;;  %v2442_v54 = vld [vmem:[%s3567_s2 + $0xa0] sm:$0xff]  }
 0x41f   :  { %v3109_v5 = vpop.f32.mrb[41].mxu0  ;;  %2362 = vmatprep.subr.bf16.mxu0 %v2442_v54  ;;  %2406 = vmatprep.subr.bf16.mxu1 %v2442_v54 }
 0x420   :  { %v1277_v47 = vadd.f32 %v1276_v0, %v3109_v5  ;;  %v3112_v50 = vpop.f32.mrb[42].mxu0  ;;  %2363 = vmatpush3.bf16.msra.mxu0 %v2442_v54  ;;  %2414 = vmatpush3.bf16.msra.mxu1 %v2442_v54 }
 0x421   :  { %v3114_v49 = vpop.f32.mrb[43].mxu0 }
 0x422   :  { %v1278_v63 = vadd.f32 %v1277_v47, %v3114_v49 }
 0x424   :  { %v1279_v59 = vadd.f32 %v3106_v56, %v1278_v63  ;;  %v2443_v63 = vld [vmem:[%s3567_s2 + $0xa8] sm:$0xff]  }
 0x425   :  { %2364 = vmatprep.subr.bf16.mxu0 %v2443_v63  ;;  %2407 = vmatprep.subr.bf16.mxu1 %v2443_v63 }
 0x426   :  { %v3118_v32 = vpop.f32.mrb[44].mxu0  ;;  %v1280_v41 = vadd.f32 %v3112_v50, %v1279_v59  ;;  %2365 = vmatpush3.bf16.msra.mxu0 %v2443_v63  ;;  %2415 = vmatpush3.bf16.msra.mxu1 %v2443_v63 }
 0x427   :  { %v3121_v46 = vpop.f32.mrb[45].mxu0 }
 0x428   :  { %v1281_v10 = vadd.f32 %v1280_v41, %v3121_v46  ;;  %v3124_v34 = vpop.f32.mrb[46].mxu0  ;;  %v2444_v41 = vld [vmem:[%s3567_s2 + $0xb0] sm:$0xff]  }
 0x429   :  { %v3126_v44 = vpop.f32.mrb[47].mxu0  ;;  %2366 = vmatprep.subr.bf16.mxu0 %v2444_v41  ;;  %2408 = vmatprep.subr.bf16.mxu1 %v2444_v41 }
 0x42a   :  { %v1282_v53 = vadd.f32 %v1281_v10, %v3126_v44  ;;  %2367 = vmatpush3.bf16.msra.mxu0 %v2444_v41  ;;  %2416 = vmatpush3.bf16.msra.mxu1 %v2444_v41 }
 0x42c   :  { %v1283_v39 = vadd.f32 %v3118_v32, %v1282_v53  ;;  %v2445_v53 = vld [vmem:[%s3567_s2 + $0xb8] sm:$0xff]  }
 0x42d   :  { %2368 = vmatprep.subr.bf16.mxu0 %v2445_v53  ;;  %2409 = vmatprep.subr.bf16.mxu1 %v2445_v53 }
 0x42e   :  { %v3130_v48 = vpop.f32.mrb[48].mxu0  ;;  %v1284_v2 = vadd.f32 %v3124_v34, %v1283_v39  ;;  %2369 = vmatpush3.bf16.msra.mxu0 %v2445_v53  ;;  %2417 = vmatpush3.bf16.msra.mxu1 %v2445_v53 }
 0x42f   :  { %v3133_v8 = vpop.f32.mrb[49].mxu0 }
 0x430   :  { %v1285_v57 = vadd.f32 %v1284_v2, %v3133_v8  ;;  %v3136_v62 = vpop.f32.mrb[50].mxu0 }
 0x431   :  { %v3138_v14 = vpop.f32.mrb[51].mxu0 }
 0x432   :  { %v1286_v51 = vadd.f32 %v1285_v57, %v3138_v14 }
 0x434   :  { %v1287_v58 = vadd.f32 %v3130_v48, %v1286_v51 }
 0x436   :  { %v3142_v55 = vpop.f32.mrb[52].mxu0  ;;  %v1288_v52 = vadd.f32 %v3136_v62, %v1287_v58 }
 0x437   :  { %v3145_v60 = vpop.f32.mrb[53].mxu0 }
 0x438   :  { %v1289_v3 = vadd.f32 %v1288_v52, %v3145_v60  ;;  %v3148_v6 = vpop.f32.mrb[54].mxu0 }
 0x439   :  { %v3150_v4 = vpop.f32.mrb[55].mxu0 }
 0x43a   :  { %v1290_v61 = vadd.f32 %v1289_v3, %v3150_v4 }
 0x43c   :  { %v1291_v11 = vadd.f32 %v3142_v55, %v1290_v61 }
 0x43e   :  { %v3154_v9 = vpop.f32.mrb[56].mxu0  ;;  %v1292_v15 = vadd.f32 %v3148_v6, %v1291_v11 }
 0x43f   :  { %v3157_v13 = vpop.f32.mrb[57].mxu0 }
 0x440   :  { %v1293_v12 = vadd.f32 %v1292_v15, %v3157_v13  ;;  %v3160_v7 = vpop.f32.mrb[58].mxu0 }
 0x441   :  { %v3165_v17 = vpop.f32.mrb[59].mxu0 }
 0x442   :  { %v1294_v18 = vadd.f32 %v1293_v12, %v3165_v17 }
 0x444   :  { %v1295_v19 = vadd.f32 %v3154_v9, %v1294_v18 }
 0x446   :  { %v3172_v25 = vpop.f32.mrb[60].mxu0  ;;  %v1296_v16 = vadd.f32 %v3160_v7, %v1295_v19 }
 0x447   :  { %v3175_v28 = vpop.f32.mrb[61].mxu0 }
 0x448   :  { %v1297_v21 = vadd.f32 %v1296_v16, %v3175_v28  ;;  %v3178_v23 = vpop.f32.mrb[62].mxu0 }
 0x449   :  { %v3183_v27 = vpop.f32.mrb[63].mxu0 }
 0x44a   :  { %v1298_v24 = vadd.f32 %v1297_v21, %v3183_v27 }
 0x44c   :  { %v1299_v37 = vadd.f32 %v3172_v25, %v1298_v24 }
 0x44e   :  { %v1300_v35 = vadd.f32 %v3178_v23, %v1299_v37 }
 0x450   :  { %v1301_v45 = vrot.slane %v1300_v35, 4 }
 0x452   :  { %v1302_v0 = vadd.f32 %v1301_v45, %v1300_v35 }
 0x454   :  { %v1303_v47 = vrot.slane %v1302_v0, 2 }
 0x456   :  { %v1304_v59 = vadd.f32 %v1303_v47, %v1302_v0 }
 0x458   :  { %v1305_v10 = vrot.slane %v1304_v59, 1 }
 0x45a   :  { %v1306_v39 = vadd.f32 %v1305_v10, %v1304_v59 }
 0x45c   :  { %v3203_v2 = vmul.f32 0.00390625, %v1306_v39 }
 0x45e   :  { %v1308_v57 = vsub.f32 %v3085_v26, %v3203_v2  ;;  %v1309_v51 = vsub.f32 %v3089_v30, %v3203_v2  ;;  %v1310_v58 = vsub.f32 %v3083_v1, %v3203_v2  ;;  %v1311_v61 = vsub.f32 %v3087_v33, %v3203_v2 }
 0x45f   :  { %v1312_v11 = vsub.f32 %v3097_v43, %v3203_v2  ;;  %v1313_v20 = vsub.f32 %v3102_v42, %v3203_v2  ;;  %v1314_v22 = vsub.f32 %v3094_v31, %v3203_v2  ;;  %v1315_v29 = vsub.f32 %v3100_v38, %v3203_v2 }
 0x460   :  { %v1340_v52 = vmul.f32 %v1308_v57, %v1308_v57  ;;  %v1341_v3 = vmul.f32 %v1309_v51, %v1309_v51  ;;  %v1342_v15 = vmul.f32 %v1310_v58, %v1310_v58  ;;  %v1343_v18 = vmul.f32 %v1311_v61, %v1311_v61 }
 0x461   :  { %v1344_v16 = vmul.f32 %v1312_v11, %v1312_v11  ;;  %v1345_v24 = vmul.f32 %v1313_v20, %v1313_v20  ;;  %v1316_v36 = vsub.f32 %v3109_v5, %v3203_v2  ;;  %v1346_v35 = vmul.f32 %v1314_v22, %v1314_v22 }
 0x462   :  { %v1372_v12 = vadd.f32 %v1341_v3, %v1340_v52  ;;  %v1317_v54 = vsub.f32 %v3114_v49, %v3203_v2  ;;  %v1347_v0 = vmul.f32 %v1315_v29, %v1315_v29  ;;  %v1318_v63 = vsub.f32 %v3106_v56, %v3203_v2 }
 0x463   :  { %v1348_v59 = vmul.f32 %v1316_v36, %v1316_v36  ;;  %v1319_v10 = vsub.f32 %v3112_v50, %v3203_v2  ;;  %v1320_v57 = vsub.f32 %v3121_v46, %v3203_v2  ;;  %v1321_v52 = vsub.f32 %v3126_v44, %v3203_v2 }
 0x464   :  { %v1373_v19 = vadd.f32 %v1372_v12, %v1342_v15  ;;  %v1349_v53 = vmul.f32 %v1317_v54, %v1317_v54  ;;  %v1350_v51 = vmul.f32 %v1318_v63, %v1318_v63  ;;  %v1322_v11 = vsub.f32 %v3118_v32, %v3203_v2 }
 0x465   :  { %v1351_v3 = vmul.f32 %v1319_v10, %v1319_v10  ;;  %v1352_v15 = vmul.f32 %v1320_v57, %v1320_v57  ;;  %v1323_v20 = vsub.f32 %v3124_v34, %v3203_v2  ;;  %v1324_v22 = vsub.f32 %v3133_v8, %v3203_v2 }
 0x466   :  { %v1374_v21 = vadd.f32 %v1373_v19, %v1343_v18  ;;  %v1353_v18 = vmul.f32 %v1321_v52, %v1321_v52  ;;  %v1325_v29 = vsub.f32 %v3138_v14, %v3203_v2  ;;  %v1326_v36 = vsub.f32 %v3130_v48, %v3203_v2 }
 0x467   :  { %v1327_v54 = vsub.f32 %v3136_v62, %v3203_v2  ;;  %v1328_v63 = vsub.f32 %v3145_v60, %v3203_v2  ;;  %v1329_v10 = vsub.f32 %v3150_v4, %v3203_v2  ;;  %v1330_v57 = vsub.f32 %v3142_v55, %v3203_v2 }
 0x468   :  { %v1375_v37 = vadd.f32 %v1374_v21, %v1344_v16  ;;  %v1354_v16 = vmul.f32 %v1322_v11, %v1322_v11  ;;  %v1331_v52 = vsub.f32 %v3148_v6, %v3203_v2  ;;  %v1332_v11 = vsub.f32 %v3157_v13, %v3203_v2 }
 0x46a   :  { %v1376_v45 = vadd.f32 %v1375_v37, %v1345_v24  ;;  %v1355_v24 = vmul.f32 %v1323_v20, %v1323_v20  ;;  %v1333_v20 = vsub.f32 %v3165_v17, %v3203_v2 }
 0x46c   :  { %v1377_v47 = vadd.f32 %v1376_v45, %v1346_v35  ;;  %v1356_v35 = vmul.f32 %v1324_v22, %v1324_v22  ;;  %v1334_v22 = vsub.f32 %v3154_v9, %v3203_v2 }
 0x46e   :  { %v1378_v41 = vadd.f32 %v1377_v47, %v1347_v0  ;;  %v1357_v0 = vmul.f32 %v1325_v29, %v1325_v29  ;;  %v1335_v29 = vsub.f32 %v3160_v7, %v3203_v2 }
 0x470   :  { %v1379_v39 = vadd.f32 %v1378_v41, %v1348_v59  ;;  %v1358_v59 = vmul.f32 %v1326_v36, %v1326_v36  ;;  %v1336_v36 = vsub.f32 %v3175_v28, %v3203_v2 }
 0x472   :  { %v1380_v58 = vadd.f32 %v1379_v39, %v1349_v53  ;;  %v1359_v53 = vmul.f32 %v1327_v54, %v1327_v54  ;;  %v1337_v54 = vsub.f32 %v3183_v27, %v3203_v2 }
 0x474   :  { %v1381_v61 = vadd.f32 %v1380_v58, %v1350_v51  ;;  %v1360_v51 = vmul.f32 %v1328_v63, %v1328_v63  ;;  %v1338_v63 = vsub.f32 %v3172_v25, %v3203_v2 }
 0x476   :  { %v1382_v12 = vadd.f32 %v1381_v61, %v1351_v3  ;;  %v1361_v3 = vmul.f32 %v1329_v10, %v1329_v10  ;;  %v1339_v10 = vsub.f32 %v3178_v23, %v3203_v2 }
 0x478   :  { %v1383_v19 = vadd.f32 %v1382_v12, %v1352_v15  ;;  %v1362_v15 = vmul.f32 %v1330_v57, %v1330_v57  ;;  %v1370_v57 = vmul.f32 %v1338_v63, %v1338_v63 }
 0x47a   :  { %v1384_v21 = vadd.f32 %v1383_v19, %v1353_v18  ;;  %v1363_v18 = vmul.f32 %v1331_v52, %v1331_v52 }
 0x47c   :  { %v1385_v37 = vadd.f32 %v1384_v21, %v1354_v16  ;;  %v1364_v16 = vmul.f32 %v1332_v11, %v1332_v11 }
 0x47e   :  { %v1386_v45 = vadd.f32 %v1385_v37, %v1355_v24  ;;  %v1365_v24 = vmul.f32 %v1333_v20, %v1333_v20 }
 0x480   :  { %v1387_v47 = vadd.f32 %v1386_v45, %v1356_v35  ;;  %v1366_v35 = vmul.f32 %v1334_v22, %v1334_v22 }
 0x482   :  { %v1388_v41 = vadd.f32 %v1387_v47, %v1357_v0  ;;  %v1367_v0 = vmul.f32 %v1335_v29, %v1335_v29 }
 0x484   :  { %v1389_v39 = vadd.f32 %v1388_v41, %v1358_v59  ;;  %v1368_v59 = vmul.f32 %v1336_v36, %v1336_v36 }
 0x486   :  { %v1390_v58 = vadd.f32 %v1389_v39, %v1359_v53  ;;  %v1369_v53 = vmul.f32 %v1337_v54, %v1337_v54 }
 0x488   :  { %v1391_v61 = vadd.f32 %v1390_v58, %v1360_v51  ;;  %v1371_v58 = vmul.f32 %v1339_v10, %v1339_v10 }
 0x48a   :  { %v1392_v12 = vadd.f32 %v1391_v61, %v1361_v3 }
 0x48c   :  { %v1393_v19 = vadd.f32 %v1392_v12, %v1362_v15 }
 0x48e   :  { %v1394_v21 = vadd.f32 %v1393_v19, %v1363_v18 }
 0x490   :  { %v1395_v37 = vadd.f32 %v1394_v21, %v1364_v16  ;;  %v1410_v16 = vld [vmem:[%s3568_s3 + $0x2] sm:$0x1] }
 0x492   :  { %v1396_v45 = vadd.f32 %v1395_v37, %v1365_v24  ;;  %v1414_v24 = vld [vmem:[%s3568_s3 + $0x6] sm:$0x1] }
 0x494   :  { %v1397_v47 = vadd.f32 %v1396_v45, %v1366_v35 }
 0x496   :  { %v1398_v41 = vadd.f32 %v1397_v47, %v1367_v0 }
 0x498   :  { %v1399_v39 = vadd.f32 %v1398_v41, %v1368_v59 }
 0x49a   :  { %v1400_v51 = vadd.f32 %v1399_v39, %v1369_v53 }
 0x49c   :  { %v1401_v52 = vadd.f32 %v1400_v51, %v1370_v57 }
 0x49e   :  { %v1402_v3 = vadd.f32 %v1401_v52, %v1371_v58 }
 0x4a0   :  { %v1403_v61 = vrot.slane %v1402_v3, 4 }
 0x4a2   :  { %v1404_v11 = vadd.f32 %v1403_v61, %v1402_v3 }
 0x4a4   :  { %v1405_v15 = vrot.slane %v1404_v11, 2 }
 0x4a6   :  { %v1406_v12 = vadd.f32 %v1405_v15, %v1404_v11 }
 0x4a8   :  { %v1407_v20 = vrot.slane %v1406_v12, 1 }
 0x4aa   :  { %v1408_v18 = vadd.f32 %v1407_v20, %v1406_v12 }
 0x4ac   :  { %v1409_v19 = vmul.f32 0.00390625, %v1408_v18 }
 0x4ae   :  { %v1411_v22 = vadd.f32 1e-05, %v1409_v19 }
 0x4b0   :  { %2450 = vrsqrt.f32 %v1411_v22 }
 0x4ba   :  { %v2451_v21 = vpop.eup %2450 }
 0x4bb   :  { %v1413_v29 = vmul.f32 %v2451_v21, %v1410_v16 }
 0x4bd   :  { %v1415_v37 = vmul.f32 %v1413_v29, %v3203_v2  ;;  %v1420_v36 = vrot.slane %v1413_v29, %v2810_v40 }
 0x4bf   :  { %v1416_v35 = vsub.f32 %v1414_v24, %v1415_v37  ;;  %v1450_v45 = vmul.f32 %v1420_v36, %v3183_v27  ;;  %v1421_v54 = vmul.f32 %v1420_v36, %v3085_v26  ;;  %v1422_v0 = vmul.f32 %v1420_v36, %v3089_v30 }
 0x4c0   :  { %v1423_v47 = vmul.f32 %v3083_v1, %v1420_v36  ;;  %v1424_v63 = vmul.f32 %v3087_v33, %v1420_v36  ;;  %v1425_v59 = vmul.f32 %v1420_v36, %v3097_v43  ;;  %v1426_v41 = vmul.f32 %v1420_v36, %v3102_v42 }
 0x4c1   :  { %v1456_v10 = vrot.slane %v1416_v35, %v2810_v40  ;;  %v1427_v2 = vmul.f32 %v3094_v31, %v1420_v36  ;;  %v1428_v53 = vmul.f32 %v3100_v38, %v1420_v36  ;;  %v1429_v27 = vmul.f32 %v1420_v36, %v3109_v5 }
 0x4c2   :  { %v1430_v26 = vmul.f32 %v1420_v36, %v3114_v49  ;;  %v1431_v30 = vmul.f32 %v3106_v56, %v1420_v36  ;;  %v1432_v1 = vmul.f32 %v3112_v50, %v1420_v36  ;;  %v1433_v33 = vmul.f32 %v1420_v36, %v3121_v46 }
 0x4c3   :  { %v3292_v39 = vadd.f32 %v1456_v10, %v1450_v45  ;;  %v1434_v43 = vmul.f32 %v1420_v36, %v3126_v44  ;;  %v1435_v42 = vmul.f32 %v3118_v32, %v1420_v36  ;;  %v1436_v31 = vmul.f32 %v3124_v34, %v1420_v36 }
 0x4c4   :  { %v1437_v38 = vmul.f32 %v1420_v36, %v3133_v8  ;;  %v1438_v5 = vmul.f32 %v1420_v36, %v3138_v14  ;;  %v1439_v49 = vmul.f32 %v3130_v48, %v1420_v36  ;;  %v1440_v56 = vmul.f32 %v3136_v62, %v1420_v36 }
 0x4c5   :  { %v1441_v50 = vmul.f32 %v1420_v36, %v3145_v60  ;;  %v1442_v46 = vmul.f32 %v1420_v36, %v3150_v4  ;;  %v1443_v57 = vmul.f32 %v3142_v55, %v1420_v36  ;;  %v1444_v44 = vmul.f32 %v3148_v6, %v1420_v36 }
 0x4c6   :  { %v1445_v32 = vmul.f32 %v1420_v36, %v3157_v13  ;;  %v1446_v34 = vmul.f32 %v1420_v36, %v3165_v17  ;;  %v1447_v8 = vmul.f32 %v3154_v9, %v1420_v36  ;;  %v1448_v14 = vmul.f32 %v3160_v7, %v1420_v36 }
 0x4c7   :  { %v1449_v48 = vmul.f32 %v1420_v36, %v3175_v28  ;;  %v1451_v62 = vmul.f32 %v3172_v25, %v1420_v36  ;;  %v1452_v60 = vmul.f32 %v3178_v23, %v1420_v36  ;;  %v1457_v51 = vadd.f32 %v1456_v10, %v1421_v54 }
 0x4c8   :  { %v1458_v4 = vadd.f32 %v1456_v10, %v1422_v0  ;;  %v1459_v58 = vadd.f32 %v1456_v10, %v1423_v47  ;;  %v1460_v55 = vadd.f32 %v1456_v10, %v1424_v63  ;;  %v1461_v52 = vadd.f32 %v1456_v10, %v1425_v59 }
 0x4c9   :  { %v1462_v6 = vadd.f32 %v1456_v10, %v1426_v41  ;;  %v1463_v3 = vadd.f32 %v1456_v10, %v1427_v2  ;;  %v1464_v13 = vadd.f32 %v1456_v10, %v1428_v53  ;;  %v1465_v61 = vadd.f32 %v1456_v10, %v1429_v27 }
 0x4ca   :  { %v1466_v17 = vadd.f32 %v1456_v10, %v1430_v26  ;;  %v1467_v11 = vadd.f32 %v1456_v10, %v1431_v30  ;;  %v1468_v9 = vadd.f32 %v1456_v10, %v1432_v1  ;;  %v1469_v15 = vadd.f32 %v1456_v10, %v1433_v33 }
 0x4cb   :  { %v1470_v7 = vadd.f32 %v1456_v10, %v1434_v43  ;;  %v1471_v12 = vadd.f32 %v1456_v10, %v1435_v42  ;;  %v1472_v28 = vadd.f32 %v1456_v10, %v1436_v31  ;;  %v1473_v20 = vadd.f32 %v1456_v10, %v1437_v38 }
 0x4cc   :  { %v1474_v25 = vadd.f32 %v1456_v10, %v1438_v5  ;;  %v1475_v18 = vadd.f32 %v1456_v10, %v1439_v49  ;;  %v1476_v23 = vadd.f32 %v1456_v10, %v1440_v56  ;;  %v1477_v19 = vadd.f32 %v1456_v10, %v1441_v50 }
 0x4cd   :  { %v1478_v22 = vadd.f32 %v1456_v10, %v1442_v46  ;;  %v1479_v16 = vadd.f32 %v1456_v10, %v1443_v57  ;;  %v1480_v21 = vadd.f32 %v1456_v10, %v1444_v44  ;;  %v1481_v29 = vadd.f32 %v1456_v10, %v1445_v32 }
 0x4ce   :  { %v1482_v24 = vadd.f32 %v1456_v10, %v1446_v34  ;;  %v1483_v37 = vadd.f32 %v1456_v10, %v1447_v8  ;;  %v1484_v36 = vadd.f32 %v1456_v10, %v1448_v14  ;;  %v1485_v35 = vadd.f32 %v1456_v10, %v1449_v48 }
 0x4cf   :  { %v1487_v45 = vadd.f32 %v1456_v10, %v1451_v62  ;;  %v1488_v54 = vadd.f32 %v1456_v10, %v1452_v60  ;;  %v1491_v0 = vmax.f32 %v1459_v58, 0.0  ;;  %v1492_v47 = vmax.f32 %v1460_v55, 0.0 }
 0x4d0   :  { %v1495_v63 = vmax.f32 %v1463_v3, 0.0  ;;  %v1496_v59 = vmax.f32 %v1464_v13, 0.0  ;;  %v1489_v41 = vmax.f32 %v1457_v51, 0.0  ;;  %v1490_v2 = vmax.f32 %v1458_v4, 0.0 }
 0x4d1   :  { %v1522_v53 = vpack.c.bf16 %v1492_v47, %v1491_v0  ;;  %v1493_v27 = vmax.f32 %v1461_v52, 0.0  ;;  %v1494_v26 = vmax.f32 %v1462_v6, 0.0  ;;  %v1497_v30 = vmax.f32 %v1465_v61, 0.0 }
 0x4d2   :  { %v1524_v1 = vpack.c.bf16 %v1496_v59, %v1495_v63  ;;  %v1521_v33 = vpack.c.bf16 %v1490_v2, %v1489_v41  ;;  %v1498_v43 = vmax.f32 %v1466_v17, 0.0  ;;  %v1499_v42 = vmax.f32 %v1467_v11, 0.0 }
 0x4d3   :  { %v1523_v31 = vpack.c.bf16 %v1494_v26, %v1493_v27  ;;  %v1500_v38 = vmax.f32 %v1468_v9, 0.0  ;;  %v1501_v5 = vmax.f32 %v1469_v15, 0.0  ;;  %v1502_v49 = vmax.f32 %v1470_v7, 0.0 }
 0x4d4   :  { %2370 = vmatprep.mubr.bf16.mxu0 %v1521_v33  ;;  %v1525_v10 = vpack.c.bf16 %v1498_v43, %v1497_v30  ;;  %v1503_v56 = vmax.f32 %v1471_v12, 0.0  ;;  %v1504_v50 = vmax.f32 %v1472_v28, 0.0  ;;  %v1505_v46 = vmax.f32 %v1473_v20, 0.0 }
 0x4d5   :  { %2374 = vmatprep.mubr.bf16.mxu1 %v1523_v31  ;;  %2371 = vmatmul.mubr.bf16.vlgmr.msra.gmra.mrb[64].mxu0 %v1522_v53  ;;  %v1526_v57 = vpack.c.bf16 %v1500_v38, %v1499_v42  ;;  %v1527_v44 = vpack.c.bf16 %v1502_v49, %v1501_v5  ;;  %v1506_v32 = vmax.f32 %v1474_v25, 0.0  ;;  %v1507_v34 = vmax.f32 %v1475_v18, 0.0 }
 0x4d6   :  { %2375 = vmatmul.mubr.bf16.vlgmr.msra.gmra.mrb[32].mxu1 %v1524_v1  ;;  %v1528_v8 = vpack.c.bf16 %v1504_v50, %v1503_v56  ;;  %v1508_v14 = vmax.f32 %v1476_v23, 0.0  ;;  %v1509_v48 = vmax.f32 %v1477_v19, 0.0  ;;  %v1510_v62 = vmax.f32 %v1478_v22, 0.0 }
 0x4d7   :  { %2378 = vmatprep.mubr.bf16.mxu1 %v1525_v10  ;;  %v1529_v60 = vpack.c.bf16 %v1506_v32, %v1505_v46  ;;  %v1511_v51 = vmax.f32 %v1479_v16, 0.0  ;;  %v1512_v4 = vmax.f32 %v1480_v21, 0.0  ;;  %v1513_v58 = vmax.f32 %v1481_v29, 0.0 }
 0x4d8   :  { %v1530_v55 = vpack.c.bf16 %v1508_v14, %v1507_v34  ;;  %v1531_v52 = vpack.c.bf16 %v1510_v62, %v1509_v48  ;;  %v1514_v6 = vmax.f32 %v1482_v24, 0.0  ;;  %v1515_v3 = vmax.f32 %v1483_v37, 0.0 }
 0x4d9   :  { %v1532_v13 = vpack.c.bf16 %v1512_v4, %v1511_v51  ;;  %v1516_v61 = vmax.f32 %v1484_v36, 0.0  ;;  %v1517_v17 = vmax.f32 %v1485_v35, 0.0  ;;  %v1518_v11 = vmax.f32 %v3292_v39, 0.0 }
 0x4da   :  { %v1533_v9 = vpack.c.bf16 %v1514_v6, %v1513_v58  ;;  %v1519_v15 = vmax.f32 %v1487_v45, 0.0  ;;  %v1520_v7 = vmax.f32 %v1488_v54, 0.0 }
 0x4db   :  { %v1534_v12 = vpack.c.bf16 %v1516_v61, %v1515_v3  ;;  %v1535_v28 = vpack.c.bf16 %v1518_v11, %v1517_v17 }
 0x4dc   :  { %v1536_v20 = vpack.c.bf16 %v1520_v7, %v1519_v15 }
 0x4de   :  { %2379 = vmatmul.mubr.bf16.gmra.mrb[36].mxu1 %v1526_v57 }
 0x4df   :  { %2382 = vmatprep.mubr.bf16.mxu1 %v1527_v44 }
 0x4e6   :  { %2383 = vmatmul.mubr.bf16.gmra.mrb[40].mxu1 %v1528_v8 }
 0x4e7   :  { %2386 = vmatprep.mubr.bf16.mxu1 %v1529_v60 }
 0x4ee   :  { %2387 = vmatmul.mubr.bf16.gmra.mrb[44].mxu1 %v1530_v55 }
 0x4ef   :  { %2390 = vmatprep.mubr.bf16.mxu1 %v1531_v52 }
 0x4f6   :  { %2391 = vmatmul.mubr.bf16.gmra.mrb[48].mxu1 %v1532_v13 }
 0x4f7   :  { %2394 = vmatprep.mubr.bf16.mxu1 %v1533_v9 }
 0x4fe   :  { %2395 = vmatmul.mubr.bf16.gmra.mrb[52].mxu1 %v1534_v12 }
 0x4ff   :  { %2398 = vmatprep.mubr.bf16.mxu1 %v1535_v28 }
 0x506   :  { %2399 = vmatmul.mubr.bf16.gmra.mrb[56].mxu1 %v1536_v20 }
 0x5a8   :  { %v3313_v25 = vpop.f32.mrb[64].mxu0 }
 0x5a9   :  { %v3315_v39 = vpop.f32.mrb[32].mxu1  ;;  %v3317_v18 = vpop.f32.mrb[65].mxu0 }
 0x5aa   :  { %v3319_v23 = vpop.f32.mrb[33].mxu1  ;;  %v3321_v19 = vpop.f32.mrb[66].mxu0 }
 0x5ab   :  { %v3323_v22 = vpop.f32.mrb[34].mxu1  ;;  %v3325_v16 = vpop.f32.mrb[67].mxu0 }
 0x5ac   :  { %v1763_v21 = vadd.f32 %v3325_v16, %v3317_v18  ;;  %v3329_v29 = vpop.f32.mrb[35].mxu1 }
 0x5ae   :  { %v1764_v24 = vadd.f32 %v3313_v25, %v1763_v21 }
 0x5b0   :  { %v1765_v37 = vadd.f32 %v3321_v19, %v1764_v24 }
 0x5b1   :  { %v3333_v36 = vpop.f32.mrb[36].mxu1 }
 0x5b2   :  { %v1766_v35 = vadd.f32 %v1765_v37, %v3319_v23  ;;  %v3336_v45 = vpop.f32.mrb[37].mxu1 }
 0x5b3   :  { %v3338_v54 = vpop.f32.mrb[38].mxu1 }
 0x5b4   :  { %v1767_v0 = vadd.f32 %v1766_v35, %v3329_v29  ;;  %v3341_v47 = vpop.f32.mrb[39].mxu1 }
 0x5b6   :  { %v1768_v63 = vadd.f32 %v3315_v39, %v1767_v0 }
 0x5b8   :  { %v1769_v59 = vadd.f32 %v3323_v22, %v1768_v63 }
 0x5b9   :  { %v3345_v41 = vpop.f32.mrb[40].mxu1 }
 0x5ba   :  { %v1770_v2 = vadd.f32 %v1769_v59, %v3336_v45  ;;  %v3348_v53 = vpop.f32.mrb[41].mxu1 }
 0x5bb   :  { %v3350_v27 = vpop.f32.mrb[42].mxu1 }
 0x5bc   :  { %v1771_v26 = vadd.f32 %v1770_v2, %v3341_v47  ;;  %v3353_v30 = vpop.f32.mrb[43].mxu1 }
 0x5be   :  { %v1772_v1 = vadd.f32 %v3333_v36, %v1771_v26 }
 0x5c0   :  { %v1773_v33 = vadd.f32 %v3338_v54, %v1772_v1 }
 0x5c1   :  { %v3357_v43 = vpop.f32.mrb[44].mxu1 }
 0x5c2   :  { %v1774_v42 = vadd.f32 %v1773_v33, %v3348_v53  ;;  %v3360_v31 = vpop.f32.mrb[45].mxu1 }
 0x5c3   :  { %v3362_v38 = vpop.f32.mrb[46].mxu1 }
 0x5c4   :  { %v1775_v5 = vadd.f32 %v1774_v42, %v3353_v30  ;;  %v3365_v49 = vpop.f32.mrb[47].mxu1 }
 0x5c6   :  { %v1776_v10 = vadd.f32 %v3345_v41, %v1775_v5 }
 0x5c8   :  { %v1777_v56 = vadd.f32 %v3350_v27, %v1776_v10 }
 0x5c9   :  { %v3369_v50 = vpop.f32.mrb[48].mxu1 }
 0x5ca   :  { %v1778_v46 = vadd.f32 %v1777_v56, %v3360_v31  ;;  %v3372_v57 = vpop.f32.mrb[49].mxu1 }
 0x5cb   :  { %v3374_v44 = vpop.f32.mrb[50].mxu1 }
 0x5cc   :  { %v1779_v32 = vadd.f32 %v1778_v46, %v3365_v49  ;;  %v3377_v34 = vpop.f32.mrb[51].mxu1 }
 0x5ce   :  { %v1780_v8 = vadd.f32 %v3357_v43, %v1779_v32 }
 0x5d0   :  { %v1781_v14 = vadd.f32 %v3362_v38, %v1780_v8 }
 0x5d1   :  { %v3381_v48 = vpop.f32.mrb[52].mxu1 }
 0x5d2   :  { %v1782_v62 = vadd.f32 %v1781_v14, %v3372_v57  ;;  %v3384_v60 = vpop.f32.mrb[53].mxu1 }
 0x5d3   :  { %v3386_v51 = vpop.f32.mrb[54].mxu1 }
 0x5d4   :  { %v1783_v4 = vadd.f32 %v1782_v62, %v3377_v34  ;;  %v3389_v58 = vpop.f32.mrb[55].mxu1 }
 0x5d6   :  { %v1784_v55 = vadd.f32 %v3369_v50, %v1783_v4 }
 0x5d8   :  { %v1785_v52 = vadd.f32 %v3374_v44, %v1784_v55 }
 0x5d9   :  { %v3393_v6 = vpop.f32.mrb[56].mxu1 }
 0x5da   :  { %v1786_v3 = vadd.f32 %v1785_v52, %v3384_v60  ;;  %v3396_v13 = vpop.f32.mrb[57].mxu1 }
 0x5db   :  { %v3398_v61 = vpop.f32.mrb[58].mxu1 }
 0x5dc   :  { %v1787_v17 = vadd.f32 %v1786_v3, %v3389_v58  ;;  %v3401_v11 = vpop.f32.mrb[59].mxu1 }
 0x5de   :  { %v1788_v9 = vadd.f32 %v3381_v48, %v1787_v17 }
 0x5e0   :  { %v1789_v15 = vadd.f32 %v3386_v51, %v1788_v9 }
 0x5e2   :  { %v1790_v7 = vadd.f32 %v1789_v15, %v3396_v13 }
 0x5e4   :  { %v1791_v12 = vadd.f32 %v1790_v7, %v3401_v11 }
 0x5e6   :  { %v1792_v28 = vadd.f32 %v3393_v6, %v1791_v12 }
 0x5e8   :  { %v1793_v20 = vadd.f32 %v3398_v61, %v1792_v28 }
 0x5ea   :  { %v1794_v21 = vrot.slane %v1793_v20, 4 }
 0x5ec   :  { %v1795_v24 = vadd.f32 %v1794_v21, %v1793_v20 }
 0x5ee   :  { %v1796_v37 = vrot.slane %v1795_v24, 2 }
 0x5f0   :  { %v1797_v35 = vadd.f32 %v1796_v37, %v1795_v24 }
 0x5f2   :  { %v1798_v0 = vrot.slane %v1797_v35, 1 }
 0x5f4   :  { %v1799_v63 = vadd.f32 %v1798_v0, %v1797_v35 }
 0x5f6   :  { %v3409_v59 = vmul.f32 0.00390625, %v1799_v63 }
 0x5f8   :  { %v1801_v2 = vsub.f32 %v3317_v18, %v3409_v59  ;;  %v1802_v26 = vsub.f32 %v3325_v16, %v3409_v59  ;;  %v1803_v1 = vsub.f32 %v3313_v25, %v3409_v59  ;;  %v1804_v5 = vsub.f32 %v3321_v19, %v3409_v59 }
 0x5f9   :  { %v1805_v10 = vsub.f32 %v3319_v23, %v3409_v59  ;;  %v1806_v32 = vsub.f32 %v3329_v29, %v3409_v59  ;;  %v1807_v62 = vsub.f32 %v3315_v39, %v3409_v59  ;;  %v1808_v52 = vsub.f32 %v3323_v22, %v3409_v59 }
 0x5fa   :  { %v1833_v33 = vmul.f32 %v1801_v2, %v1801_v2  ;;  %v1834_v42 = vmul.f32 %v1802_v26, %v1802_v26  ;;  %v1835_v56 = vmul.f32 %v1803_v1, %v1803_v1  ;;  %v1836_v8 = vmul.f32 %v1804_v5, %v1804_v5 }
 0x5fb   :  { %v1837_v4 = vmul.f32 %v1805_v10, %v1805_v10  ;;  %v1838_v3 = vmul.f32 %v1806_v32, %v1806_v32  ;;  %v1809_v9 = vsub.f32 %v3336_v45, %v3409_v59  ;;  %v1839_v15 = vmul.f32 %v1807_v62, %v1807_v62 }
 0x5fc   :  { %v1865_v46 = vadd.f32 %v1834_v42, %v1833_v33  ;;  %v1810_v12 = vsub.f32 %v3341_v47, %v3409_v59  ;;  %v1840_v28 = vmul.f32 %v1808_v52, %v1808_v52  ;;  %v1811_v21 = vsub.f32 %v3333_v36, %v3409_v59 }
 0x5fd   :  { %v1841_v24 = vmul.f32 %v1809_v9, %v1809_v9  ;;  %v1812_v35 = vsub.f32 %v3338_v54, %v3409_v59  ;;  %v1813_v2 = vsub.f32 %v3348_v53, %v3409_v59  ;;  %v1814_v33 = vsub.f32 %v3353_v30, %v3409_v59 }
 0x5fe   :  { %v1866_v14 = vadd.f32 %v1865_v46, %v1835_v56  ;;  %v1842_v0 = vmul.f32 %v1810_v12, %v1810_v12  ;;  %v1843_v26 = vmul.f32 %v1811_v21, %v1811_v21  ;;  %v1815_v10 = vsub.f32 %v3345_v41, %v3409_v59 }
 0x5ff   :  { %v1844_v42 = vmul.f32 %v1812_v35, %v1812_v35  ;;  %v1845_v56 = vmul.f32 %v1813_v2, %v1813_v2  ;;  %v1816_v32 = vsub.f32 %v3350_v27, %v3409_v59  ;;  %v1817_v62 = vsub.f32 %v3360_v31, %v3409_v59 }
 0x600   :  { %v1867_v55 = vadd.f32 %v1866_v14, %v1836_v8  ;;  %v1846_v8 = vmul.f32 %v1814_v33, %v1814_v33  ;;  %v1818_v52 = vsub.f32 %v3365_v49, %v3409_v59  ;;  %v1819_v9 = vsub.f32 %v3357_v43, %v3409_v59 }
 0x601   :  { %v1820_v12 = vsub.f32 %v3362_v38, %v3409_v59  ;;  %v1821_v21 = vsub.f32 %v3372_v57, %v3409_v59  ;;  %v1822_v35 = vsub.f32 %v3377_v34, %v3409_v59  ;;  %v1823_v2 = vsub.f32 %v3369_v50, %v3409_v59 }
 0x602   :  { %v1868_v17 = vadd.f32 %v1867_v55, %v1837_v4  ;;  %v1847_v4 = vmul.f32 %v1815_v10, %v1815_v10  ;;  %v1824_v33 = vsub.f32 %v3374_v44, %v3409_v59  ;;  %v1825_v10 = vsub.f32 %v3384_v60, %v3409_v59 }
 0x604   :  { %v1869_v7 = vadd.f32 %v1868_v17, %v1838_v3  ;;  %v1848_v3 = vmul.f32 %v1816_v32, %v1816_v32  ;;  %v1826_v32 = vsub.f32 %v3389_v58, %v3409_v59 }
 0x606   :  { %v1870_v20 = vadd.f32 %v1869_v7, %v1839_v15  ;;  %v1849_v15 = vmul.f32 %v1817_v62, %v1817_v62  ;;  %v1827_v62 = vsub.f32 %v3381_v48, %v3409_v59 }
 0x608   :  { %v1871_v37 = vadd.f32 %v1870_v20, %v1840_v28  ;;  %v1850_v28 = vmul.f32 %v1818_v52, %v1818_v52  ;;  %v1828_v52 = vsub.f32 %v3386_v51, %v3409_v59 }
 0x60a   :  { %v1872_v63 = vadd.f32 %v1871_v37, %v1841_v24  ;;  %v1851_v24 = vmul.f32 %v1819_v9, %v1819_v9  ;;  %v1829_v9 = vsub.f32 %v3396_v13, %v3409_v59 }
 0x60c   :  { %v1873_v1 = vadd.f32 %v1872_v63, %v1842_v0  ;;  %v1852_v0 = vmul.f32 %v1820_v12, %v1820_v12  ;;  %v1830_v12 = vsub.f32 %v3401_v11, %v3409_v59 }
 0x60e   :  { %v1874_v5 = vadd.f32 %v1873_v1, %v1843_v26  ;;  %v1853_v26 = vmul.f32 %v1821_v21, %v1821_v21  ;;  %v1831_v21 = vsub.f32 %v3393_v6, %v3409_v59 }
 0x610   :  { %v1875_v46 = vadd.f32 %v1874_v5, %v1844_v42  ;;  %v1854_v42 = vmul.f32 %v1822_v35, %v1822_v35  ;;  %v1832_v35 = vsub.f32 %v3398_v61, %v3409_v59 }
 0x612   :  { %v1876_v14 = vadd.f32 %v1875_v46, %v1845_v56  ;;  %v1855_v56 = vmul.f32 %v1823_v2, %v1823_v2  ;;  %v1863_v2 = vmul.f32 %v1831_v21, %v1831_v21 }
 0x614   :  { %v1877_v55 = vadd.f32 %v1876_v14, %v1846_v8  ;;  %v1856_v8 = vmul.f32 %v1824_v33, %v1824_v33 }
 0x616   :  { %v1878_v17 = vadd.f32 %v1877_v55, %v1847_v4  ;;  %v1857_v4 = vmul.f32 %v1825_v10, %v1825_v10 }
 0x618   :  { %v1879_v7 = vadd.f32 %v1878_v17, %v1848_v3  ;;  %v1858_v3 = vmul.f32 %v1826_v32, %v1826_v32 }
 0x61a   :  { %v1880_v20 = vadd.f32 %v1879_v7, %v1849_v15  ;;  %v1859_v15 = vmul.f32 %v1827_v62, %v1827_v62 }
 0x61c   :  { %v1881_v37 = vadd.f32 %v1880_v20, %v1850_v28  ;;  %v1860_v28 = vmul.f32 %v1828_v52, %v1828_v52 }
 0x61e   :  { %v1882_v63 = vadd.f32 %v1881_v37, %v1851_v24  ;;  %v1861_v24 = vmul.f32 %v1829_v9, %v1829_v9 }
 0x620   :  { %v1883_v1 = vadd.f32 %v1882_v63, %v1852_v0  ;;  %v1862_v0 = vmul.f32 %v1830_v12, %v1830_v12 }
 0x622   :  { %v1884_v5 = vadd.f32 %v1883_v1, %v1853_v26  ;;  %v1864_v1 = vmul.f32 %v1832_v35, %v1832_v35 }
 0x624   :  { %v1885_v46 = vadd.f32 %v1884_v5, %v1854_v42 }
 0x626   :  { %v1886_v14 = vadd.f32 %v1885_v46, %v1855_v56 }
 0x628   :  { %v1887_v55 = vadd.f32 %v1886_v14, %v1856_v8 }
 0x62a   :  { %v1888_v17 = vadd.f32 %v1887_v55, %v1857_v4  ;;  %v1903_v4 = vld [vmem:[%s3568_s3 + $0x3] sm:$0x1] }
 0x62c   :  { %v1889_v7 = vadd.f32 %v1888_v17, %v1858_v3  ;;  %v1907_v3 = vld [vmem:[%s3568_s3 + $0x7] sm:$0x1]  ;;  %s2478_s3 = smov [#allocation2]  }
 0x62d   :  { %s2051_s6 = sshll.u32 %s2478_s3, 4  ;;  %s3544_s6 = int_to_ptr.vmem [resolvable:$true] %s2051_s6 }
 0x62e   :  { %v1890_v20 = vadd.f32 %v1889_v7, %v1859_v15  ;;  %s2454_s7 = scalar_lea.vmem %s3544_s6, 4096  ;;  %p2459_p1 = scmp.lt.s32.totalorder %s3544_s6, %s3544_s6 }
 0x62f   :  { %p2455_p0 = scmp.ne.s32.totalorder %s3544_s6, %s2454_s7  ;;  %p2460_p2 = scmp.lt.s32.totalorder %s2454_s7, %s2454_s7 }
 0x630   :  { %v1891_v37 = vadd.f32 %v1890_v20, %v1860_v28 }
 0x631   :  { %p2461_p3 = por %p2460_p2, %p2459_p1 }
 0x632   :  { %v1892_v63 = vadd.f32 %v1891_v37, %v1861_v24 }
 0x633   :  { %p2462_p4 = pnand %p2461_p3, %p2455_p0 }
 0x634   :  { %v1893_v26 = vadd.f32 %v1892_v63, %v1862_v0 }
 0x636   :  { %v1894_v33 = vadd.f32 %v1893_v26, %v1863_v2 }
 0x638   :  { %v1895_v42 = vadd.f32 %v1894_v33, %v1864_v1 }
 0x63a   :  { %v1896_v5 = vrot.slane %v1895_v42, 4 }
 0x63c   :  { %v1897_v10 = vadd.f32 %v1896_v5, %v1895_v42 }
 0x63e   :  { %v1898_v56 = vrot.slane %v1897_v10, 2 }
 0x640   :  { %v1899_v46 = vadd.f32 %v1898_v56, %v1897_v10 }
 0x642   :  { %v1900_v32 = vrot.slane %v1899_v46, 1 }
 0x644   :  { %v1901_v8 = vadd.f32 %v1900_v32, %v1899_v46 }
 0x646   :  { %v1902_v14 = vmul.f32 0.00390625, %v1901_v8 }
 0x648   :  { %v1904_v62 = vadd.f32 1e-05, %v1902_v14 }
 0x64a   :  { %2452 = vrsqrt.f32 %v1904_v62 }
 0x654   :  { %v2453_v55 = vpop.eup %2452 }
 0x655   :  { %v1906_v52 = vmul.f32 %v2453_v55, %v1903_v4 }
 0x657   :  { %v1908_v17 = vmul.f32 %v1906_v52, %v3409_v59  ;;  %v1913_v9 = vrot.slane %v1906_v52, %v2810_v40 }
 0x659   :  { %v1909_v15 = vsub.f32 %v1907_v3, %v1908_v17  ;;  %v1943_v7 = vmul.f32 %v1913_v9, %v3401_v11  ;;  %v1914_v12 = vmul.f32 %v1913_v9, %v3317_v18  ;;  %v1915_v28 = vmul.f32 %v1913_v9, %v3325_v16 }
 0x65a   :  { %v1916_v20 = vmul.f32 %v3313_v25, %v1913_v9  ;;  %v1917_v21 = vmul.f32 %v3321_v19, %v1913_v9  ;;  %v1918_v24 = vmul.f32 %v1913_v9, %v3319_v23  ;;  %v1919_v37 = vmul.f32 %v1913_v9, %v3329_v29 }
 0x65b   :  { %v1949_v35 = vrot.slane %v1909_v15, %v2810_v40  ;;  %v1920_v59 = vmul.f32 %v3315_v39, %v1913_v9  ;;  %v1921_v0 = vmul.f32 %v3323_v22, %v1913_v9  ;;  %v1922_v11 = vmul.f32 %v1913_v9, %v3336_v45 }
 0x65c   :  { %v1923_v18 = vmul.f32 %v1913_v9, %v3341_v47  ;;  %v1924_v16 = vmul.f32 %v3333_v36, %v1913_v9  ;;  %v1925_v25 = vmul.f32 %v3338_v54, %v1913_v9  ;;  %v1926_v19 = vmul.f32 %v1913_v9, %v3348_v53 }
 0x65d   :  { %v1979_v63 = vadd.f32 %v1949_v35, %v1943_v7  ;;  %v1927_v23 = vmul.f32 %v1913_v9, %v3353_v30  ;;  %v1928_v29 = vmul.f32 %v3345_v41, %v1913_v9  ;;  %v1929_v40 = vmul.f32 %v3350_v27, %v1913_v9 }
 0x65e   :  { %v1930_v39 = vmul.f32 %v1913_v9, %v3360_v31  ;;  %v1931_v22 = vmul.f32 %v1913_v9, %v3365_v49  ;;  %v1932_v45 = vmul.f32 %v3357_v43, %v1913_v9  ;;  %v1933_v47 = vmul.f32 %v3362_v38, %v1913_v9 }
 0x65f   :  { %v2011_v36 = vmax.f32 %v1979_v63, 0.0  ;;  %v1934_v54 = vmul.f32 %v1913_v9, %v3372_v57  ;;  %v1935_v53 = vmul.f32 %v1913_v9, %v3377_v34  ;;  %v1936_v2 = vmul.f32 %v3369_v50, %v1913_v9 }
 0x660   :  { %v1937_v30 = vmul.f32 %v3374_v44, %v1913_v9  ;;  %v1938_v41 = vmul.f32 %v1913_v9, %v3384_v60  ;;  %v1939_v27 = vmul.f32 %v1913_v9, %v3389_v58  ;;  %v1940_v31 = vmul.f32 %v3381_v48, %v1913_v9 }
 0x661   :  { %2043 = vst [vmem:[#allocation2 + $0xe8] sm:$0xff] %v2011_v36  ;;  %v1941_v43 = vmul.f32 %v3386_v51, %v1913_v9  ;;  %v1942_v38 = vmul.f32 %v1913_v9, %v3396_v13  ;;  %v1944_v49 = vmul.f32 %v3393_v6, %v1913_v9  ;;  %v1945_v57 = vmul.f32 %v3398_v61, %v1913_v9 }
 0x662   :  { %v1950_v34 = vadd.f32 %v1949_v35, %v1914_v12  ;;  %v1951_v26 = vadd.f32 %v1949_v35, %v1915_v28  ;;  %v1952_v50 = vadd.f32 %v1949_v35, %v1916_v20  ;;  %v1953_v1 = vadd.f32 %v1949_v35, %v1917_v21 }
 0x663   :  { %v1954_v44 = vadd.f32 %v1949_v35, %v1918_v24  ;;  %v1955_v33 = vadd.f32 %v1949_v35, %v1919_v37  ;;  %v1956_v60 = vadd.f32 %v1949_v35, %v1920_v59  ;;  %v1957_v42 = vadd.f32 %v1949_v35, %v1921_v0 }
 0x664   :  { %v1958_v58 = vadd.f32 %v1949_v35, %v1922_v11  ;;  %v1959_v5 = vadd.f32 %v1949_v35, %v1923_v18  ;;  %v1960_v48 = vadd.f32 %v1949_v35, %v1924_v16  ;;  %v1961_v10 = vadd.f32 %v1949_v35, %v1925_v25 }
 0x665   :  { %v1962_v56 = vadd.f32 %v1949_v35, %v1926_v19  ;;  %v1963_v51 = vadd.f32 %v1949_v35, %v1927_v23  ;;  %v1964_v46 = vadd.f32 %v1949_v35, %v1928_v29  ;;  %v1965_v13 = vadd.f32 %v1949_v35, %v1929_v40 }
 0x666   :  { %v1966_v32 = vadd.f32 %v1949_v35, %v1930_v39  ;;  %v1967_v6 = vadd.f32 %v1949_v35, %v1931_v22  ;;  %v1968_v8 = vadd.f32 %v1949_v35, %v1932_v45  ;;  %v1969_v61 = vadd.f32 %v1949_v35, %v1933_v47 }
 0x667   :  { %v1970_v14 = vadd.f32 %v1949_v35, %v1934_v54  ;;  %v3516_v62 = vadd.f32 %v1949_v35, %v1935_v53  ;;  %v3518_v4 = vadd.f32 %v1949_v35, %v1936_v2  ;;  %v3520_v55 = vadd.f32 %v1949_v35, %v1937_v30 }
 0x668   :  { %v3522_v52 = vadd.f32 %v1949_v35, %v1938_v41  ;;  %v3524_v3 = vadd.f32 %v1949_v35, %v1939_v27  ;;  %v3526_v17 = vadd.f32 %v1949_v35, %v1940_v31  ;;  %v3528_v9 = vadd.f32 %v1949_v35, %v1941_v43 }
 0x669   :  { %v3530_v15 = vadd.f32 %v1949_v35, %v1942_v38  ;;  %v3532_v7 = vadd.f32 %v1949_v35, %v1944_v49  ;;  %v3534_v12 = vadd.f32 %v1949_v35, %v1945_v57  ;;  %v1982_v28 = vmax.f32 %v1950_v34, 0.0 }
 0x66a   :  { %v1983_v20 = vmax.f32 %v1951_v26, 0.0  ;;  %v1984_v21 = vmax.f32 %v1952_v50, 0.0  ;;  %v1985_v24 = vmax.f32 %v1953_v1, 0.0  ;;  %v1986_v37 = vmax.f32 %v1954_v44, 0.0 }
 0x66b   :  { %v1987_v59 = vmax.f32 %v1955_v33, 0.0  ;;  %v1988_v0 = vmax.f32 %v1956_v60, 0.0  ;;  %v1989_v11 = vmax.f32 %v1957_v42, 0.0  ;;  %v1990_v18 = vmax.f32 %v1958_v58, 0.0  ;;  %2014 = vst [vmem:[#allocation2] sm:$0xff] %v1982_v28 }
 0x66c   :  { %v1991_v16 = vmax.f32 %v1959_v5, 0.0  ;;  %v1992_v25 = vmax.f32 %v1960_v48, 0.0  ;;  %v1993_v19 = vmax.f32 %v1961_v10, 0.0  ;;  %v1994_v63 = vmax.f32 %v1962_v56, 0.0  ;;  %2015 = vst [vmem:[#allocation2 + $0x8] sm:$0xff] %v1983_v20  ;;  %2016 = vst [vmem:[#allocation2 + $0x10] sm:$0xff] %v1984_v21 }
 0x66d   :  { %2017 = vst [vmem:[#allocation2 + $0x18] sm:$0xff] %v1985_v24  ;;  %2018 = vst [vmem:[#allocation2 + $0x20] sm:$0xff] %v1986_v37  ;;  %v1995_v35 = vmax.f32 %v1963_v51, 0.0  ;;  %v1996_v23 = vmax.f32 %v1964_v46, 0.0  ;;  %v1997_v29 = vmax.f32 %v1965_v13, 0.0  ;;  %v1998_v40 = vmax.f32 %v1966_v32, 0.0 }
 0x66e   :  { %2019 = vst [vmem:[#allocation2 + $0x28] sm:$0xff] %v1987_v59  ;;  %2020 = vst [vmem:[#allocation2 + $0x30] sm:$0xff] %v1988_v0  ;;  %v1999_v39 = vmax.f32 %v1967_v6, 0.0  ;;  %v2000_v22 = vmax.f32 %v1968_v8, 0.0  ;;  %v2001_v45 = vmax.f32 %v1969_v61, 0.0  ;;  %v2002_v47 = vmax.f32 %v1970_v14, 0.0 }
 0x66f   :  { %2021 = vst [vmem:[#allocation2 + $0x38] sm:$0xff] %v1989_v11  ;;  %2022 = vst [vmem:[#allocation2 + $0x40] sm:$0xff] %v1990_v18  ;;  %v2003_v36 = vmax.f32 %v3516_v62, 0.0  ;;  %v2004_v54 = vmax.f32 %v3518_v4, 0.0  ;;  %v2005_v53 = vmax.f32 %v3520_v55, 0.0  ;;  %v2006_v2 = vmax.f32 %v3522_v52, 0.0 }
 0x670   :  { %2023 = vst [vmem:[#allocation2 + $0x48] sm:$0xff] %v1991_v16  ;;  %2024 = vst [vmem:[#allocation2 + $0x50] sm:$0xff] %v1992_v25  ;;  %v2007_v30 = vmax.f32 %v3524_v3, 0.0  ;;  %v2008_v41 = vmax.f32 %v3526_v17, 0.0  ;;  %v2009_v27 = vmax.f32 %v3528_v9, 0.0  ;;  %v2010_v31 = vmax.f32 %v3530_v15, 0.0 }
 0x671   :  { %2025 = vst [vmem:[#allocation2 + $0x58] sm:$0xff] %v1993_v19  ;;  %2026 = vst [vmem:[#allocation2 + $0x60] sm:$0xff] %v1994_v63  ;;  %v2012_v43 = vmax.f32 %v3532_v7, 0.0  ;;  %v2013_v38 = vmax.f32 %v3534_v12, 0.0 }
 0x672   :  { %2027 = vst [vmem:[#allocation2 + $0x68] sm:$0xff] %v1995_v35  ;;  %2028 = vst [vmem:[#allocation2 + $0x70] sm:$0xff] %v1996_v23 }
 0x673   :  { %2029 = vst [vmem:[#allocation2 + $0x78] sm:$0xff] %v1997_v29  ;;  %2030 = vst [vmem:[#allocation2 + $0x80] sm:$0xff] %v1998_v40 }
 0x674   :  { %2031 = vst [vmem:[#allocation2 + $0x88] sm:$0xff] %v1999_v39  ;;  %2032 = vst [vmem:[#allocation2 + $0x90] sm:$0xff] %v2000_v22 }
 0x675   :  { %2033 = vst [vmem:[#allocation2 + $0x98] sm:$0xff] %v2001_v45  ;;  %2034 = vst [vmem:[#allocation2 + $0xa0] sm:$0xff] %v2002_v47 }
 0x676   :  { %2035 = vst [vmem:[#allocation2 + $0xa8] sm:$0xff] %v2003_v36  ;;  %2036 = vst [vmem:[#allocation2 + $0xb0] sm:$0xff] %v2004_v54 }
 0x677   :  { %2037 = vst [vmem:[#allocation2 + $0xb8] sm:$0xff] %v2005_v53  ;;  %2038 = vst [vmem:[#allocation2 + $0xc0] sm:$0xff] %v2006_v2 }
 0x678   :  { %2039 = vst [vmem:[#allocation2 + $0xc8] sm:$0xff] %v2007_v30  ;;  %2040 = vst [vmem:[#allocation2 + $0xd0] sm:$0xff] %v2008_v41 }
 0x679   :  { %2041 = vst [vmem:[#allocation2 + $0xd8] sm:$0xff] %v2009_v27  ;;  %2042 = vst [vmem:[#allocation2 + $0xe0] sm:$0xff] %v2010_v31 }
 0x67a   :  { %2044 = vst [vmem:[#allocation2 + $0xf0] sm:$0xff] %v2012_v43  ;;  %2045 = vst [vmem:[#allocation2 + $0xf8] sm:$0xff] %v2013_v38 }
 0x67b   :  { %2465 = shalt.err (!%p2462_p4)
}
 0x67c   :  { %s2466_s10 = scalar_lea.hbm %s3569_s4, 4096 }
 0x67d   :  { %p2467_p5 = scmp.ne.s32.totalorder %s3569_s4, %s2466_s10  ;;  %p2470_p6 = scmp.lt.u32.totalorder %s2466_s10, %s3569_s4 }
 0x67f   :  { %p2472_p7 = pnand %p2470_p6, %p2467_p5 }
 0x681   :  { %2475 = shalt.err (!%p2472_p7)
}
 0x682   :  { %s2479_s15 = smov 128   ;;  %s2480_s16 = smov 8  }
 0x683   :  { %2057 = dma.vmem_to_hbm [thread:$0]  %s3544_s6, 4096, %s3569_s4, [#allocation3], %s2479_s15, %s2479_s15, %s2480_s16  }
 0x684   :  { %2476 = dma.done.wait [#allocation3], 4096  }
 0x685   :  { %2477 = vsyncadd [#allocation3], 4294963200 }
 0x686   :  { %2061 = vsyncpa [#allocation3], 1 }

</bundles_post_ra>
